<compile_context>
chip_gen: v5e
topology: v5e:2x2
jax: 0.10.0
libtpu: 0.0.40
codegen_flags: <defaults>
</compile_context>

<pallas_src>
import jax
import jax.numpy as jnp
import numpy as np
from jax.experimental import pallas as pl
from jax.experimental.pallas import tpu as pltpu

# ----------------------------- sizes -----------------------------------
B = 2          # batch
T = 8          # encoder sequence length
T_OUT = 8      # target_seq_len (must be <= T: teacher forcing reads x[:, t, :])
D = 32         # input_size == output_size (decoder.ff.out_features)
H = 32         # LSTM hidden size
TEACHER_FORCING_RATIO = 0.5


# ----------------------------- kernel ----------------------------------
def seq2seq_kernel(tf_ref,                  # SMEM (T_OUT,) int32
                   xwi_e_ref,               # VMEM (T, B, 4H)   x@Wi_e + b_e (scaled)
                   wh_e_ref,                # VMEM (H, 4H)      Wh_e (scaled)
                   xwi_d_ref,               # VMEM (T_OUT,B,4H) x@Wi_d + b_d (scaled)
                   w_dec_ref,               # VMEM (H, 8H)      [Wh_d | Wff@Wi_d] (scaled)
                   b_d_ref,                 # VMEM (1, 4H)      b_d (scaled)
                   b_nf_ref,                # VMEM (1, 4H)      bff@Wi_d + b_d (scaled)
                   wff_ref,                 # VMEM (H, D)
                   bff_ref,                 # VMEM (1, D)
                   out_ref,                 # VMEM (T_OUT*B, D)
                   h_stage_ref):            # VMEM scratch (T_OUT*B, H)
    n_b = xwi_e_ref.shape[1]
    g4 = xwi_e_ref.shape[2]                 # 4H
    hidden = g4 // 4
    t_enc = xwi_e_ref.shape[0]
    t_dec = xwi_d_ref.shape[0]
    d_out = wff_ref.shape[1]

    # Hoist weights and bias broadcasts once — JAX does not CSE
    # broadcast_in_dim inside the unrolled recurrence.
    wh_e = wh_e_ref[...]
    w_dec = w_dec_ref[...]
    wff = wff_ref[...]
    b_d0 = jnp.broadcast_to(b_d_ref[...], (n_b, g4))
    b_nf = jnp.broadcast_to(b_nf_ref[...], (n_b, g4))
    bff = jnp.broadcast_to(bff_ref[...], (t_dec * n_b, d_out))

    def gates_to_state(gates, c):
        # Single EUP pass over the full (B, 4H) gates tensor.  i/f/o columns
        # of the weights were pre-scaled by 0.5, so sigmoid(z) = 0.5*t + 0.5.
        th = jnp.tanh(gates)
        sg = 0.5 * th + 0.5
        i = sg[:, 0 * hidden:1 * hidden]
        f = sg[:, 1 * hidden:2 * hidden]
        g = th[:, 2 * hidden:3 * hidden]
        o = sg[:, 3 * hidden:4 * hidden]
        c_new = f * c + i * g
        h_new = o * jnp.tanh(c_new)
        return h_new, c_new

    # ---------------- encoder (fully unrolled, state stays in vregs) -------
    c = jnp.zeros((n_b, hidden), jnp.float32)
    # step 0: h == 0, so gates are exactly the precomputed input projection
    h, c = gates_to_state(xwi_e_ref[0], c)
    for t in range(1, t_enc):
        gates = jnp.dot(h, wh_e, preferred_element_type=jnp.float32) + xwi_e_ref[t]
        h, c = gates_to_state(gates, c)

    # ---------------- decoder: autoregressive with teacher forcing ---------
    for t in range(t_dec):
        # One fused MXU push: recurrent term and folded (prev-output @ Wi_d)
        # term computed together as h @ [Wh_d | Wff@Wi_d].
        hw = jnp.dot(h, w_dec, preferred_element_type=jnp.float32)   # (B, 8H)
        rec = hw[:, :g4]
        if t == 0:
            inp = b_d0                              # decoder_input = zeros
        else:
            foldp = hw[:, g4:]                       # (prev out) @ Wi_d, minus bias
            use_tf = tf_ref[t - 1] > 0
            inp = jnp.where(use_tf, xwi_d_ref[t - 1], foldp + b_nf)
        h, c = gates_to_state(rec + inp, c)
        # stage h_t; the FF projection happens once, after the recurrence
        h_stage_ref[t * n_b:(t + 1) * n_b, :] = h

    # ---------------- batched output projection (off the serial chain) -----
    hs = h_stage_ref[...]                                            # (T_OUT*B, H)
    out_ref[...] = jnp.dot(hs, wff, preferred_element_type=jnp.float32) + bff


# ----------------------------- wrapper ----------------------------------
def _gate_scale():
    # i, f, o columns scaled by 0.5 for the sigmoid-via-tanh trick; g untouched.
    return jnp.concatenate([jnp.full((1, 2 * H), 0.5, jnp.float32),
                            jnp.ones((1, H), jnp.float32),
                            jnp.full((1, H), 0.5, jnp.float32)], axis=1)


@jax.jit
def seq2seq_lstm(x, tf_mask, params):
    """x: (B, T, D) float32; tf_mask: (T_OUT,) int32. Returns (B, T_OUT, D)."""
    (wi_e, wh_e, b_e, wi_d, wh_d, b_d, wff, bff) = params
    hp = jax.lax.Precision.HIGHEST
    gscale = _gate_scale()

    # Pre-scale all gate weights/biases (sigmoid-via-tanh).
    wi_e_s, wh_e_s, b_e_s = wi_e * gscale, wh_e * gscale, b_e * gscale
    wi_d_s, wh_d_s, b_d_s = wi_d * gscale, wh_d * gscale, b_d * gscale

    x_tm = jnp.transpose(x, (1, 0, 2))                       # time-major (T, B, D)

    # Batched input projections — one parallel matmul each, off the recurrence.
    xwi_e = jnp.einsum('tbd,dg->tbg', x_tm, wi_e_s, precision=hp) + b_e_s
    xwi_d = jnp.einsum('tbd,dg->tbg', x_tm[:T_OUT], wi_d_s, precision=hp) + b_d_s

    # Fold the FF layer into the decoder input projection.
    w_fold = jnp.dot(wff, wi_d_s, precision=hp)              # (H, 4H)
    b_nf = jnp.dot(bff, wi_d_s, precision=hp) + b_d_s        # (1, 4H)
    w_dec = jnp.concatenate([wh_d_s, w_fold], axis=1)        # (H, 8H)

    vmem = pl.BlockSpec(memory_space=pltpu.MemorySpace.VMEM)
    smem = pl.BlockSpec(memory_space=pltpu.MemorySpace.SMEM)

    out_flat = pl.pallas_call(
        seq2seq_kernel,
        out_shape=jax.ShapeDtypeStruct((T_OUT * B, D), jnp.float32),
        in_specs=[smem] + [vmem] * 8,
        out_specs=vmem,
        scratch_shapes=[pltpu.VMEM((T_OUT * B, H), jnp.float32)],
    )(tf_mask, xwi_e, wh_e_s, xwi_d, w_dec, b_d_s, b_nf, wff, bff)

    # (T_OUT*B, D) time-major slab -> (B, T_OUT, D)
    return jnp.transpose(out_flat.reshape(T_OUT, B, D), (1, 0, 2))


# ------------------------- pure-JAX reference ----------------------------
def seq2seq_reference(x, tf_mask, params):
    (wi_e, wh_e, b_e, wi_d, wh_d, b_d, wff, bff) = params
    hp = jax.lax.Precision.HIGHEST

    def lstm_step(x_t, h, c, wi, wh, b):
        gates = (jnp.dot(x_t, wi, precision=hp)
                 + jnp.dot(h, wh, precision=hp) + b)
        i = jax.nn.sigmoid(gates[:, 0 * H:1 * H])
        f = jax.nn.sigmoid(gates[:, 1 * H:2 * H])
        g = jnp.tanh(gates[:, 2 * H:3 * H])
        o = jax.nn.sigmoid(gates[:, 3 * H:4 * H])
        c = f * c + i * g
        h = o * jnp.tanh(c)
        return h, c

    h = jnp.zeros((B, H), jnp.float32)
    c = jnp.zeros((B, H), jnp.float32)
    for t in range(T):
        h, c = lstm_step(x[:, t, :], h, c, wi_e, wh_e, b_e)

    din = jnp.zeros((B, D), jnp.float32)
    outs = []
    for t in range(T_OUT):
        h, c = lstm_step(din, h, c, wi_d, wh_d, b_d)
        out = jnp.dot(h, wff, precision=hp) + bff
        outs.append(out)
        din = jnp.where(tf_mask[t] > 0, x[:, t, :], out)
    return jnp.stack(outs, axis=1)


# ----------------------------- params ------------------------------------
def init_params(key):
    scale = 1.0 / np.sqrt(H)

    def u(k, shape):
        return jax.random.uniform(k, shape, jnp.float32, -scale, scale)

    ks = jax.random.split(key, 10)
    # stored pre-transposed for right-multiplication: x @ W
    wi_e = u(ks[0], (D, 4 * H))
    wh_e = u(ks[1], (H, 4 * H))
    b_e = u(ks[2], (1, 4 * H)) + u(ks[3], (1, 4 * H))    # b_ih + b_hh
    wi_d = u(ks[4], (D, 4 * H))
    wh_d = u(ks[5], (H, 4 * H))
    b_d = u(ks[6], (1, 4 * H)) + u(ks[7], (1, 4 * H))
    wff = u(ks[8], (H, D))
    bff = u(ks[9], (1, D))
    return (wi_e, wh_e, b_e, wi_d, wh_d, b_d, wff, bff)


# ----------------------------- main ---------------------------------------
if __name__ == "__main__":
    key = jax.random.PRNGKey(0)
    k_x, k_p, k_tf = jax.random.split(key, 3)

    x = jax.random.normal(k_x, (B, T, D), jnp.float32)
    params = init_params(k_p)
    # TODO(synk): deterministic stand-in for the per-step torch.rand(1).item()
    # < teacher_forcing_ratio coin flips (host RNG has no in-kernel equivalent).
    tf_mask = (jax.random.uniform(k_tf, (T_OUT,))
               < TEACHER_FORCING_RATIO).astype(jnp.int32)

    out = seq2seq_lstm(x, tf_mask, params)
    out = jax.block_until_ready(out)

    ref = seq2seq_reference(x, tf_mask, params)
    # Slightly looser than 2e-5: sigmoid-via-tanh and the FF/projection
    # algebraic folds re-associate a few float32 ops.
    np.testing.assert_allclose(np.asarray(out), np.asarray(ref),
                               rtol=1e-4, atol=1e-4)
    assert out.shape == (B, T_OUT, D)
    print("KERNEL_OK")
</pallas_src>

<mosaic_0001>
module attributes {stable_mosaic.version = 11 : i64} {
  func.func @seq2seq_kernel(%arg0: memref<8xi32, #tpu.memory_space<smem>>, %arg1: memref<8x2x128xf32, #tpu.memory_space<vmem>>, %arg2: memref<32x128xf32, #tpu.memory_space<vmem>>, %arg3: memref<8x2x128xf32, #tpu.memory_space<vmem>>, %arg4: memref<32x256xf32, #tpu.memory_space<vmem>>, %arg5: memref<1x128xf32, #tpu.memory_space<vmem>>, %arg6: memref<1x128xf32, #tpu.memory_space<vmem>>, %arg7: memref<32x32xf32, #tpu.memory_space<vmem>>, %arg8: memref<1x32xf32, #tpu.memory_space<vmem>>, %arg9: memref<16x32xf32, #tpu.memory_space<vmem>>, %arg10: memref<16x32xf32, #tpu.memory_space<vmem>>) attributes {dimension_semantics = [], scalar_prefetch = 0 : i64, scratch_operands = 1 : i64, tpu.core_type = #tpu.core_type<tc>} {
    %c0 = arith.constant 0 : index
    %c0_0 = arith.constant 0 : index
    %0 = vector.load %arg2[%c0, %c0_0] : memref<32x128xf32, #tpu.memory_space<vmem>>, vector<32x128xf32>
    %c0_1 = arith.constant 0 : index
    %c0_2 = arith.constant 0 : index
    %1 = vector.load %arg4[%c0_1, %c0_2] : memref<32x256xf32, #tpu.memory_space<vmem>>, vector<32x256xf32>
    %c0_3 = arith.constant 0 : index
    %c0_4 = arith.constant 0 : index
    %2 = vector.load %arg7[%c0_3, %c0_4] : memref<32x32xf32, #tpu.memory_space<vmem>>, vector<32x32xf32>
    %c0_5 = arith.constant 0 : index
    %c0_6 = arith.constant 0 : index
    %3 = vector.load %arg5[%c0_5, %c0_6] : memref<1x128xf32, #tpu.memory_space<vmem>>, vector<1x128xf32>
    %4 = vector.shape_cast %3 : vector<1x128xf32> to vector<1x128xf32>
    %5 = vector.broadcast %4 : vector<1x128xf32> to vector<2x128xf32>
    %c0_7 = arith.constant 0 : index
    %c0_8 = arith.constant 0 : index
    %6 = vector.load %arg6[%c0_7, %c0_8] : memref<1x128xf32, #tpu.memory_space<vmem>>, vector<1x128xf32>
    %7 = vector.shape_cast %6 : vector<1x128xf32> to vector<1x128xf32>
    %8 = vector.broadcast %7 : vector<1x128xf32> to vector<2x128xf32>
    %c0_9 = arith.constant 0 : index
    %c0_10 = arith.constant 0 : index
    %9 = vector.load %arg8[%c0_9, %c0_10] : memref<1x32xf32, #tpu.memory_space<vmem>>, vector<1x32xf32>
    %10 = vector.shape_cast %9 : vector<1x32xf32> to vector<1x32xf32>
    %11 = vector.broadcast %10 : vector<1x32xf32> to vector<16x32xf32>
    %cst = arith.constant 0.000000e+00 : f32
    %12 = vector.broadcast %cst : f32 to vector<2x32xf32>
    %c0_11 = arith.constant 0 : index
    %c0_12 = arith.constant 0 : index
    %c0_13 = arith.constant 0 : index
    %13 = vector.load %arg1[%c0_11, %c0_12, %c0_13] : memref<8x2x128xf32, #tpu.memory_space<vmem>>, vector<1x2x128xf32>
    %14 = vector.shape_cast %13 : vector<1x2x128xf32> to vector<2x128xf32>
    %15 = math.tanh %14 : vector<2x128xf32>
    %cst_14 = arith.constant 5.000000e-01 : f32
    %16 = vector.broadcast %cst_14 : f32 to vector<2x128xf32>
    %17 = arith.mulf %16, %15 : vector<2x128xf32>
    %cst_15 = arith.constant 5.000000e-01 : f32
    %18 = vector.broadcast %cst_15 : f32 to vector<2x128xf32>
    %19 = arith.addf %17, %18 : vector<2x128xf32>
    %20 = vector.extract_strided_slice %19 {offsets = [0, 0], sizes = [2, 32], strides = [1, 1]} : vector<2x128xf32> to vector<2x32xf32>
    %21 = vector.extract_strided_slice %19 {offsets = [0, 32], sizes = [2, 32], strides = [1, 1]} : vector<2x128xf32> to vector<2x32xf32>
    %22 = vector.extract_strided_slice %15 {offsets = [0, 64], sizes = [2, 32], strides = [1, 1]} : vector<2x128xf32> to vector<2x32xf32>
    %23 = vector.extract_strided_slice %19 {offsets = [0, 96], sizes = [2, 32], strides = [1, 1]} : vector<2x128xf32> to vector<2x32xf32>
    %24 = arith.mulf %21, %12 : vector<2x32xf32>
    %25 = arith.mulf %20, %22 : vector<2x32xf32>
    %26 = arith.addf %24, %25 : vector<2x32xf32>
    %27 = math.tanh %26 : vector<2x32xf32>
    %28 = arith.mulf %23, %27 : vector<2x32xf32>
    %cst_16 = arith.constant dense<0.000000e+00> : vector<2x128xf32>
    %29 = tpu.matmul %28, %0, %cst_16 {dimension_numbers = #tpu.dot_dimension_numbers<[1], [0], [0], [1], [0, 0, 1, 1], [], []>} : vector<2x32xf32>, vector<32x128xf32>, vector<2x128xf32> -> vector<2x128xf32>
    %c1 = arith.constant 1 : index
    %c0_17 = arith.constant 0 : index
    %c0_18 = arith.constant 0 : index
    %30 = vector.load %arg1[%c1, %c0_17, %c0_18] : memref<8x2x128xf32, #tpu.memory_space<vmem>>, vector<1x2x128xf32>
    %31 = vector.shape_cast %30 : vector<1x2x128xf32> to vector<2x128xf32>
    %32 = arith.addf %29, %31 : vector<2x128xf32>
    %33 = math.tanh %32 : vector<2x128xf32>
    %cst_19 = arith.constant 5.000000e-01 : f32
    %34 = vector.broadcast %cst_19 : f32 to vector<2x128xf32>
    %35 = arith.mulf %34, %33 : vector<2x128xf32>
    %cst_20 = arith.constant 5.000000e-01 : f32
    %36 = vector.broadcast %cst_20 : f32 to vector<2x128xf32>
    %37 = arith.addf %35, %36 : vector<2x128xf32>
    %38 = vector.extract_strided_slice %37 {offsets = [0, 0], sizes = [2, 32], strides = [1, 1]} : vector<2x128xf32> to vector<2x32xf32>
    %39 = vector.extract_strided_slice %37 {offsets = [0, 32], sizes = [2, 32], strides = [1, 1]} : vector<2x128xf32> to vector<2x32xf32>
    %40 = vector.extract_strided_slice %33 {offsets = [0, 64], sizes = [2, 32], strides = [1, 1]} : vector<2x128xf32> to vector<2x32xf32>
    %41 = vector.extract_strided_slice %37 {offsets = [0, 96], sizes = [2, 32], strides = [1, 1]} : vector<2x128xf32> to vector<2x32xf32>
    %42 = arith.mulf %39, %26 : vector<2x32xf32>
    %43 = arith.mulf %38, %40 : vector<2x32xf32>
    %44 = arith.addf %42, %43 : vector<2x32xf32>
    %45 = math.tanh %44 : vector<2x32xf32>
    %46 = arith.mulf %41, %45 : vector<2x32xf32>
    %cst_21 = arith.constant dense<0.000000e+00> : vector<2x128xf32>
    %47 = tpu.matmul %46, %0, %cst_21 {dimension_numbers = #tpu.dot_dimension_numbers<[1], [0], [0], [1], [0, 0, 1, 1], [], []>} : vector<2x32xf32>, vector<32x128xf32>, vector<2x128xf32> -> vector<2x128xf32>
    %c2 = arith.constant 2 : index
    %c0_22 = arith.constant 0 : index
    %c0_23 = arith.constant 0 : index
    %48 = vector.load %arg1[%c2, %c0_22, %c0_23] : memref<8x2x128xf32, #tpu.memory_space<vmem>>, vector<1x2x128xf32>
    %49 = vector.shape_cast %48 : vector<1x2x128xf32> to vector<2x128xf32>
    %50 = arith.addf %47, %49 : vector<2x128xf32>
    %51 = math.tanh %50 : vector<2x128xf32>
    %cst_24 = arith.constant 5.000000e-01 : f32
    %52 = vector.broadcast %cst_24 : f32 to vector<2x128xf32>
    %53 = arith.mulf %52, %51 : vector<2x128xf32>
    %cst_25 = arith.constant 5.000000e-01 : f32
    %54 = vector.broadcast %cst_25 : f32 to vector<2x128xf32>
    %55 = arith.addf %53, %54 : vector<2x128xf32>
    %56 = vector.extract_strided_slice %55 {offsets = [0, 0], sizes = [2, 32], strides = [1, 1]} : vector<2x128xf32> to vector<2x32xf32>
    %57 = vector.extract_strided_slice %55 {offsets = [0, 32], sizes = [2, 32], strides = [1, 1]} : vector<2x128xf32> to vector<2x32xf32>
    %58 = vector.extract_strided_slice %51 {offsets = [0, 64], sizes = [2, 32], strides = [1, 1]} : vector<2x128xf32> to vector<2x32xf32>
    %59 = vector.extract_strided_slice %55 {offsets = [0, 96], sizes = [2, 32], strides = [1, 1]} : vector<2x128xf32> to vector<2x32xf32>
    %60 = arith.mulf %57, %44 : vector<2x32xf32>
    %61 = arith.mulf %56, %58 : vector<2x32xf32>
    %62 = arith.addf %60, %61 : vector<2x32xf32>
    %63 = math.tanh %62 : vector<2x32xf32>
    %64 = arith.mulf %59, %63 : vector<2x32xf32>
    %cst_26 = arith.constant dense<0.000000e+00> : vector<2x128xf32>
    %65 = tpu.matmul %64, %0, %cst_26 {dimension_numbers = #tpu.dot_dimension_numbers<[1], [0], [0], [1], [0, 0, 1, 1], [], []>} : vector<2x32xf32>, vector<32x128xf32>, vector<2x128xf32> -> vector<2x128xf32>
    %c3 = arith.constant 3 : index
    %c0_27 = arith.constant 0 : index
    %c0_28 = arith.constant 0 : index
    %66 = vector.load %arg1[%c3, %c0_27, %c0_28] : memref<8x2x128xf32, #tpu.memory_space<vmem>>, vector<1x2x128xf32>
    %67 = vector.shape_cast %66 : vector<1x2x128xf32> to vector<2x128xf32>
    %68 = arith.addf %65, %67 : vector<2x128xf32>
    %69 = math.tanh %68 : vector<2x128xf32>
    %cst_29 = arith.constant 5.000000e-01 : f32
    %70 = vector.broadcast %cst_29 : f32 to vector<2x128xf32>
    %71 = arith.mulf %70, %69 : vector<2x128xf32>
    %cst_30 = arith.constant 5.000000e-01 : f32
    %72 = vector.broadcast %cst_30 : f32 to vector<2x128xf32>
    %73 = arith.addf %71, %72 : vector<2x128xf32>
    %74 = vector.extract_strided_slice %73 {offsets = [0, 0], sizes = [2, 32], strides = [1, 1]} : vector<2x128xf32> to vector<2x32xf32>
    %75 = vector.extract_strided_slice %73 {offsets = [0, 32], sizes = [2, 32], strides = [1, 1]} : vector<2x128xf32> to vector<2x32xf32>
    %76 = vector.extract_strided_slice %69 {offsets = [0, 64], sizes = [2, 32], strides = [1, 1]} : vector<2x128xf32> to vector<2x32xf32>
    %77 = vector.extract_strided_slice %73 {offsets = [0, 96], sizes = [2, 32], strides = [1, 1]} : vector<2x128xf32> to vector<2x32xf32>
    %78 = arith.mulf %75, %62 : vector<2x32xf32>
    %79 = arith.mulf %74, %76 : vector<2x32xf32>
    %80 = arith.addf %78, %79 : vector<2x32xf32>
    %81 = math.tanh %80 : vector<2x32xf32>
    %82 = arith.mulf %77, %81 : vector<2x32xf32>
    %cst_31 = arith.constant dense<0.000000e+00> : vector<2x128xf32>
    %83 = tpu.matmul %82, %0, %cst_31 {dimension_numbers = #tpu.dot_dimension_numbers<[1], [0], [0], [1], [0, 0, 1, 1], [], []>} : vector<2x32xf32>, vector<32x128xf32>, vector<2x128xf32> -> vector<2x128xf32>
    %c4 = arith.constant 4 : index
    %c0_32 = arith.constant 0 : index
    %c0_33 = arith.constant 0 : index
    %84 = vector.load %arg1[%c4, %c0_32, %c0_33] : memref<8x2x128xf32, #tpu.memory_space<vmem>>, vector<1x2x128xf32>
    %85 = vector.shape_cast %84 : vector<1x2x128xf32> to vector<2x128xf32>
    %86 = arith.addf %83, %85 : vector<2x128xf32>
    %87 = math.tanh %86 : vector<2x128xf32>
    %cst_34 = arith.constant 5.000000e-01 : f32
    %88 = vector.broadcast %cst_34 : f32 to vector<2x128xf32>
    %89 = arith.mulf %88, %87 : vector<2x128xf32>
    %cst_35 = arith.constant 5.000000e-01 : f32
    %90 = vector.broadcast %cst_35 : f32 to vector<2x128xf32>
    %91 = arith.addf %89, %90 : vector<2x128xf32>
    %92 = vector.extract_strided_slice %91 {offsets = [0, 0], sizes = [2, 32], strides = [1, 1]} : vector<2x128xf32> to vector<2x32xf32>
    %93 = vector.extract_strided_slice %91 {offsets = [0, 32], sizes = [2, 32], strides = [1, 1]} : vector<2x128xf32> to vector<2x32xf32>
    %94 = vector.extract_strided_slice %87 {offsets = [0, 64], sizes = [2, 32], strides = [1, 1]} : vector<2x128xf32> to vector<2x32xf32>
    %95 = vector.extract_strided_slice %91 {offsets = [0, 96], sizes = [2, 32], strides = [1, 1]} : vector<2x128xf32> to vector<2x32xf32>
    %96 = arith.mulf %93, %80 : vector<2x32xf32>
    %97 = arith.mulf %92, %94 : vector<2x32xf32>
    %98 = arith.addf %96, %97 : vector<2x32xf32>
    %99 = math.tanh %98 : vector<2x32xf32>
    %100 = arith.mulf %95, %99 : vector<2x32xf32>
    %cst_36 = arith.constant dense<0.000000e+00> : vector<2x128xf32>
    %101 = tpu.matmul %100, %0, %cst_36 {dimension_numbers = #tpu.dot_dimension_numbers<[1], [0], [0], [1], [0, 0, 1, 1], [], []>} : vector<2x32xf32>, vector<32x128xf32>, vector<2x128xf32> -> vector<2x128xf32>
    %c5 = arith.constant 5 : index
    %c0_37 = arith.constant 0 : index
    %c0_38 = arith.constant 0 : index
    %102 = vector.load %arg1[%c5, %c0_37, %c0_38] : memref<8x2x128xf32, #tpu.memory_space<vmem>>, vector<1x2x128xf32>
    %103 = vector.shape_cast %102 : vector<1x2x128xf32> to vector<2x128xf32>
    %104 = arith.addf %101, %103 : vector<2x128xf32>
    %105 = math.tanh %104 : vector<2x128xf32>
    %cst_39 = arith.constant 5.000000e-01 : f32
    %106 = vector.broadcast %cst_39 : f32 to vector<2x128xf32>
    %107 = arith.mulf %106, %105 : vector<2x128xf32>
    %cst_40 = arith.constant 5.000000e-01 : f32
    %108 = vector.broadcast %cst_40 : f32 to vector<2x128xf32>
    %109 = arith.addf %107, %108 : vector<2x128xf32>
    %110 = vector.extract_strided_slice %109 {offsets = [0, 0], sizes = [2, 32], strides = [1, 1]} : vector<2x128xf32> to vector<2x32xf32>
    %111 = vector.extract_strided_slice %109 {offsets = [0, 32], sizes = [2, 32], strides = [1, 1]} : vector<2x128xf32> to vector<2x32xf32>
    %112 = vector.extract_strided_slice %105 {offsets = [0, 64], sizes = [2, 32], strides = [1, 1]} : vector<2x128xf32> to vector<2x32xf32>
    %113 = vector.extract_strided_slice %109 {offsets = [0, 96], sizes = [2, 32], strides = [1, 1]} : vector<2x128xf32> to vector<2x32xf32>
    %114 = arith.mulf %111, %98 : vector<2x32xf32>
    %115 = arith.mulf %110, %112 : vector<2x32xf32>
    %116 = arith.addf %114, %115 : vector<2x32xf32>
    %117 = math.tanh %116 : vector<2x32xf32>
    %118 = arith.mulf %113, %117 : vector<2x32xf32>
    %cst_41 = arith.constant dense<0.000000e+00> : vector<2x128xf32>
    %119 = tpu.matmul %118, %0, %cst_41 {dimension_numbers = #tpu.dot_dimension_numbers<[1], [0], [0], [1], [0, 0, 1, 1], [], []>} : vector<2x32xf32>, vector<32x128xf32>, vector<2x128xf32> -> vector<2x128xf32>
    %c6 = arith.constant 6 : index
    %c0_42 = arith.constant 0 : index
    %c0_43 = arith.constant 0 : index
    %120 = vector.load %arg1[%c6, %c0_42, %c0_43] : memref<8x2x128xf32, #tpu.memory_space<vmem>>, vector<1x2x128xf32>
    %121 = vector.shape_cast %120 : vector<1x2x128xf32> to vector<2x128xf32>
    %122 = arith.addf %119, %121 : vector<2x128xf32>
    %123 = math.tanh %122 : vector<2x128xf32>
    %cst_44 = arith.constant 5.000000e-01 : f32
    %124 = vector.broadcast %cst_44 : f32 to vector<2x128xf32>
    %125 = arith.mulf %124, %123 : vector<2x128xf32>
    %cst_45 = arith.constant 5.000000e-01 : f32
    %126 = vector.broadcast %cst_45 : f32 to vector<2x128xf32>
    %127 = arith.addf %125, %126 : vector<2x128xf32>
    %128 = vector.extract_strided_slice %127 {offsets = [0, 0], sizes = [2, 32], strides = [1, 1]} : vector<2x128xf32> to vector<2x32xf32>
    %129 = vector.extract_strided_slice %127 {offsets = [0, 32], sizes = [2, 32], strides = [1, 1]} : vector<2x128xf32> to vector<2x32xf32>
    %130 = vector.extract_strided_slice %123 {offsets = [0, 64], sizes = [2, 32], strides = [1, 1]} : vector<2x128xf32> to vector<2x32xf32>
    %131 = vector.extract_strided_slice %127 {offsets = [0, 96], sizes = [2, 32], strides = [1, 1]} : vector<2x128xf32> to vector<2x32xf32>
    %132 = arith.mulf %129, %116 : vector<2x32xf32>
    %133 = arith.mulf %128, %130 : vector<2x32xf32>
    %134 = arith.addf %132, %133 : vector<2x32xf32>
    %135 = math.tanh %134 : vector<2x32xf32>
    %136 = arith.mulf %131, %135 : vector<2x32xf32>
    %cst_46 = arith.constant dense<0.000000e+00> : vector<2x128xf32>
    %137 = tpu.matmul %136, %0, %cst_46 {dimension_numbers = #tpu.dot_dimension_numbers<[1], [0], [0], [1], [0, 0, 1, 1], [], []>} : vector<2x32xf32>, vector<32x128xf32>, vector<2x128xf32> -> vector<2x128xf32>
    %c7 = arith.constant 7 : index
    %c0_47 = arith.constant 0 : index
    %c0_48 = arith.constant 0 : index
    %138 = vector.load %arg1[%c7, %c0_47, %c0_48] : memref<8x2x128xf32, #tpu.memory_space<vmem>>, vector<1x2x128xf32>
    %139 = vector.shape_cast %138 : vector<1x2x128xf32> to vector<2x128xf32>
    %140 = arith.addf %137, %139 : vector<2x128xf32>
    %141 = math.tanh %140 : vector<2x128xf32>
    %cst_49 = arith.constant 5.000000e-01 : f32
    %142 = vector.broadcast %cst_49 : f32 to vector<2x128xf32>
    %143 = arith.mulf %142, %141 : vector<2x128xf32>
    %cst_50 = arith.constant 5.000000e-01 : f32
    %144 = vector.broadcast %cst_50 : f32 to vector<2x128xf32>
    %145 = arith.addf %143, %144 : vector<2x128xf32>
    %146 = vector.extract_strided_slice %145 {offsets = [0, 0], sizes = [2, 32], strides = [1, 1]} : vector<2x128xf32> to vector<2x32xf32>
    %147 = vector.extract_strided_slice %145 {offsets = [0, 32], sizes = [2, 32], strides = [1, 1]} : vector<2x128xf32> to vector<2x32xf32>
    %148 = vector.extract_strided_slice %141 {offsets = [0, 64], sizes = [2, 32], strides = [1, 1]} : vector<2x128xf32> to vector<2x32xf32>
    %149 = vector.extract_strided_slice %145 {offsets = [0, 96], sizes = [2, 32], strides = [1, 1]} : vector<2x128xf32> to vector<2x32xf32>
    %150 = arith.mulf %147, %134 : vector<2x32xf32>
    %151 = arith.mulf %146, %148 : vector<2x32xf32>
    %152 = arith.addf %150, %151 : vector<2x32xf32>
    %153 = math.tanh %152 : vector<2x32xf32>
    %154 = arith.mulf %149, %153 : vector<2x32xf32>
    %cst_51 = arith.constant dense<0.000000e+00> : vector<2x256xf32>
    %155 = tpu.matmul %154, %1, %cst_51 {dimension_numbers = #tpu.dot_dimension_numbers<[1], [0], [0], [1], [0, 0, 1, 1], [], []>} : vector<2x32xf32>, vector<32x256xf32>, vector<2x256xf32> -> vector<2x256xf32>
    %156 = vector.extract_strided_slice %155 {offsets = [0, 0], sizes = [2, 128], strides = [1, 1]} : vector<2x256xf32> to vector<2x128xf32>
    %157 = arith.addf %156, %5 : vector<2x128xf32>
    %158 = math.tanh %157 : vector<2x128xf32>
    %cst_52 = arith.constant 5.000000e-01 : f32
    %159 = vector.broadcast %cst_52 : f32 to vector<2x128xf32>
    %160 = arith.mulf %159, %158 : vector<2x128xf32>
    %cst_53 = arith.constant 5.000000e-01 : f32
    %161 = vector.broadcast %cst_53 : f32 to vector<2x128xf32>
    %162 = arith.addf %160, %161 : vector<2x128xf32>
    %163 = vector.extract_strided_slice %162 {offsets = [0, 0], sizes = [2, 32], strides = [1, 1]} : vector<2x128xf32> to vector<2x32xf32>
    %164 = vector.extract_strided_slice %162 {offsets = [0, 32], sizes = [2, 32], strides = [1, 1]} : vector<2x128xf32> to vector<2x32xf32>
    %165 = vector.extract_strided_slice %158 {offsets = [0, 64], sizes = [2, 32], strides = [1, 1]} : vector<2x128xf32> to vector<2x32xf32>
    %166 = vector.extract_strided_slice %162 {offsets = [0, 96], sizes = [2, 32], strides = [1, 1]} : vector<2x128xf32> to vector<2x32xf32>
    %167 = arith.mulf %164, %152 : vector<2x32xf32>
    %168 = arith.mulf %163, %165 : vector<2x32xf32>
    %169 = arith.addf %167, %168 : vector<2x32xf32>
    %170 = math.tanh %169 : vector<2x32xf32>
    %171 = arith.mulf %166, %170 : vector<2x32xf32>
    %c0_54 = arith.constant 0 : index
    %c0_55 = arith.constant 0 : index
    %172 = vector.load %arg10[%c0_54, %c0_55] : memref<16x32xf32, #tpu.memory_space<vmem>>, vector<2x32xf32>
    tpu.vector_store %arg10[%c0_54, %c0_55], %171 {strides = array<i32>} : memref<16x32xf32, #tpu.memory_space<vmem>>, vector<2x32xf32>,
    %cst_56 = arith.constant dense<0.000000e+00> : vector<2x256xf32>
    %173 = tpu.matmul %171, %1, %cst_56 {dimension_numbers = #tpu.dot_dimension_numbers<[1], [0], [0], [1], [0, 0, 1, 1], [], []>} : vector<2x32xf32>, vector<32x256xf32>, vector<2x256xf32> -> vector<2x256xf32>
    %174 = vector.extract_strided_slice %173 {offsets = [0, 0], sizes = [2, 128], strides = [1, 1]} : vector<2x256xf32> to vector<2x128xf32>
    %175 = vector.extract_strided_slice %173 {offsets = [0, 128], sizes = [2, 128], strides = [1, 1]} : vector<2x256xf32> to vector<2x128xf32>
    %c0_57 = arith.constant 0 : index
    %176 = memref.load %arg0[%c0_57] : memref<8xi32, #tpu.memory_space<smem>>
    %c0_i32 = arith.constant 0 : i32
    %177 = arith.cmpi sgt, %176, %c0_i32 : i32
    %c0_58 = arith.constant 0 : index
    %c0_59 = arith.constant 0 : index
    %c0_60 = arith.constant 0 : index
    %178 = vector.load %arg3[%c0_58, %c0_59, %c0_60] : memref<8x2x128xf32, #tpu.memory_space<vmem>>, vector<1x2x128xf32>
    %179 = vector.shape_cast %178 : vector<1x2x128xf32> to vector<2x128xf32>
    %180 = arith.addf %175, %8 : vector<2x128xf32>
    %181 = arith.select %177, %179, %180 : vector<2x128xf32>
    %182 = arith.addf %174, %181 : vector<2x128xf32>
    %183 = math.tanh %182 : vector<2x128xf32>
    %cst_61 = arith.constant 5.000000e-01 : f32
    %184 = vector.broadcast %cst_61 : f32 to vector<2x128xf32>
    %185 = arith.mulf %184, %183 : vector<2x128xf32>
    %cst_62 = arith.constant 5.000000e-01 : f32
    %186 = vector.broadcast %cst_62 : f32 to vector<2x128xf32>
    %187 = arith.addf %185, %186 : vector<2x128xf32>
    %188 = vector.extract_strided_slice %187 {offsets = [0, 0], sizes = [2, 32], strides = [1, 1]} : vector<2x128xf32> to vector<2x32xf32>
    %189 = vector.extract_strided_slice %187 {offsets = [0, 32], sizes = [2, 32], strides = [1, 1]} : vector<2x128xf32> to vector<2x32xf32>
    %190 = vector.extract_strided_slice %183 {offsets = [0, 64], sizes = [2, 32], strides = [1, 1]} : vector<2x128xf32> to vector<2x32xf32>
    %191 = vector.extract_strided_slice %187 {offsets = [0, 96], sizes = [2, 32], strides = [1, 1]} : vector<2x128xf32> to vector<2x32xf32>
    %192 = arith.mulf %189, %169 : vector<2x32xf32>
    %193 = arith.mulf %188, %190 : vector<2x32xf32>
    %194 = arith.addf %192, %193 : vector<2x32xf32>
    %195 = math.tanh %194 : vector<2x32xf32>
    %196 = arith.mulf %191, %195 : vector<2x32xf32>
    %c2_63 = arith.constant 2 : index
    %c0_64 = arith.constant 0 : index
    %197 = vector.load %arg10[%c2_63, %c0_64] : memref<16x32xf32, #tpu.memory_space<vmem>>, vector<2x32xf32>
    tpu.vector_store %arg10[%c2_63, %c0_64], %196 {strides = array<i32>} : memref<16x32xf32, #tpu.memory_space<vmem>>, vector<2x32xf32>,
    %cst_65 = arith.constant dense<0.000000e+00> : vector<2x256xf32>
    %198 = tpu.matmul %196, %1, %cst_65 {dimension_numbers = #tpu.dot_dimension_numbers<[1], [0], [0], [1], [0, 0, 1, 1], [], []>} : vector<2x32xf32>, vector<32x256xf32>, vector<2x256xf32> -> vector<2x256xf32>
    %199 = vector.extract_strided_slice %198 {offsets = [0, 0], sizes = [2, 128], strides = [1, 1]} : vector<2x256xf32> to vector<2x128xf32>
    %200 = vector.extract_strided_slice %198 {offsets = [0, 128], sizes = [2, 128], strides = [1, 1]} : vector<2x256xf32> to vector<2x128xf32>
    %c1_66 = arith.constant 1 : index
    %201 = memref.load %arg0[%c1_66] : memref<8xi32, #tpu.memory_space<smem>>
    %c0_i32_67 = arith.constant 0 : i32
    %202 = arith.cmpi sgt, %201, %c0_i32_67 : i32
    %c1_68 = arith.constant 1 : index
    %c0_69 = arith.constant 0 : index
    %c0_70 = arith.constant 0 : index
    %203 = vector.load %arg3[%c1_68, %c0_69, %c0_70] : memref<8x2x128xf32, #tpu.memory_space<vmem>>, vector<1x2x128xf32>
    %204 = vector.shape_cast %203 : vector<1x2x128xf32> to vector<2x128xf32>
    %205 = arith.addf %200, %8 : vector<2x128xf32>
    %206 = arith.select %202, %204, %205 : vector<2x128xf32>
    %207 = arith.addf %199, %206 : vector<2x128xf32>
    %208 = math.tanh %207 : vector<2x128xf32>
    %cst_71 = arith.constant 5.000000e-01 : f32
    %209 = vector.broadcast %cst_71 : f32 to vector<2x128xf32>
    %210 = arith.mulf %209, %208 : vector<2x128xf32>
    %cst_72 = arith.constant 5.000000e-01 : f32
    %211 = vector.broadcast %cst_72 : f32 to vector<2x128xf32>
    %212 = arith.addf %210, %211 : vector<2x128xf32>
    %213 = vector.extract_strided_slice %212 {offsets = [0, 0], sizes = [2, 32], strides = [1, 1]} : vector<2x128xf32> to vector<2x32xf32>
    %214 = vector.extract_strided_slice %212 {offsets = [0, 32], sizes = [2, 32], strides = [1, 1]} : vector<2x128xf32> to vector<2x32xf32>
    %215 = vector.extract_strided_slice %208 {offsets = [0, 64], sizes = [2, 32], strides = [1, 1]} : vector<2x128xf32> to vector<2x32xf32>
    %216 = vector.extract_strided_slice %212 {offsets = [0, 96], sizes = [2, 32], strides = [1, 1]} : vector<2x128xf32> to vector<2x32xf32>
    %217 = arith.mulf %214, %194 : vector<2x32xf32>
    %218 = arith.mulf %213, %215 : vector<2x32xf32>
    %219 = arith.addf %217, %218 : vector<2x32xf32>
    %220 = math.tanh %219 : vector<2x32xf32>
    %221 = arith.mulf %216, %220 : vector<2x32xf32>
    %c4_73 = arith.constant 4 : index
    %c0_74 = arith.constant 0 : index
    %222 = vector.load %arg10[%c4_73, %c0_74] : memref<16x32xf32, #tpu.memory_space<vmem>>, vector<2x32xf32>
    tpu.vector_store %arg10[%c4_73, %c0_74], %221 {strides = array<i32>} : memref<16x32xf32, #tpu.memory_space<vmem>>, vector<2x32xf32>,
    %cst_75 = arith.constant dense<0.000000e+00> : vector<2x256xf32>
    %223 = tpu.matmul %221, %1, %cst_75 {dimension_numbers = #tpu.dot_dimension_numbers<[1], [0], [0], [1], [0, 0, 1, 1], [], []>} : vector<2x32xf32>, vector<32x256xf32>, vector<2x256xf32> -> vector<2x256xf32>
    %224 = vector.extract_strided_slice %223 {offsets = [0, 0], sizes = [2, 128], strides = [1, 1]} : vector<2x256xf32> to vector<2x128xf32>
    %225 = vector.extract_strided_slice %223 {offsets = [0, 128], sizes = [2, 128], strides = [1, 1]} : vector<2x256xf32> to vector<2x128xf32>
    %c2_76 = arith.constant 2 : index
    %226 = memref.load %arg0[%c2_76] : memref<8xi32, #tpu.memory_space<smem>>
    %c0_i32_77 = arith.constant 0 : i32
    %227 = arith.cmpi sgt, %226, %c0_i32_77 : i32
    %c2_78 = arith.constant 2 : index
    %c0_79 = arith.constant 0 : index
    %c0_80 = arith.constant 0 : index
    %228 = vector.load %arg3[%c2_78, %c0_79, %c0_80] : memref<8x2x128xf32, #tpu.memory_space<vmem>>, vector<1x2x128xf32>
    %229 = vector.shape_cast %228 : vector<1x2x128xf32> to vector<2x128xf32>
    %230 = arith.addf %225, %8 : vector<2x128xf32>
    %231 = arith.select %227, %229, %230 : vector<2x128xf32>
    %232 = arith.addf %224, %231 : vector<2x128xf32>
    %233 = math.tanh %232 : vector<2x128xf32>
    %cst_81 = arith.constant 5.000000e-01 : f32
    %234 = vector.broadcast %cst_81 : f32 to vector<2x128xf32>
    %235 = arith.mulf %234, %233 : vector<2x128xf32>
    %cst_82 = arith.constant 5.000000e-01 : f32
    %236 = vector.broadcast %cst_82 : f32 to vector<2x128xf32>
    %237 = arith.addf %235, %236 : vector<2x128xf32>
    %238 = vector.extract_strided_slice %237 {offsets = [0, 0], sizes = [2, 32], strides = [1, 1]} : vector<2x128xf32> to vector<2x32xf32>
    %239 = vector.extract_strided_slice %237 {offsets = [0, 32], sizes = [2, 32], strides = [1, 1]} : vector<2x128xf32> to vector<2x32xf32>
    %240 = vector.extract_strided_slice %233 {offsets = [0, 64], sizes = [2, 32], strides = [1, 1]} : vector<2x128xf32> to vector<2x32xf32>
    %241 = vector.extract_strided_slice %237 {offsets = [0, 96], sizes = [2, 32], strides = [1, 1]} : vector<2x128xf32> to vector<2x32xf32>
    %242 = arith.mulf %239, %219 : vector<2x32xf32>
    %243 = arith.mulf %238, %240 : vector<2x32xf32>
    %244 = arith.addf %242, %243 : vector<2x32xf32>
    %245 = math.tanh %244 : vector<2x32xf32>
    %246 = arith.mulf %241, %245 : vector<2x32xf32>
    %c6_83 = arith.constant 6 : index
    %c0_84 = arith.constant 0 : index
    %247 = vector.load %arg10[%c6_83, %c0_84] : memref<16x32xf32, #tpu.memory_space<vmem>>, vector<2x32xf32>
    tpu.vector_store %arg10[%c6_83, %c0_84], %246 {strides = array<i32>} : memref<16x32xf32, #tpu.memory_space<vmem>>, vector<2x32xf32>,
    %cst_85 = arith.constant dense<0.000000e+00> : vector<2x256xf32>
    %248 = tpu.matmul %246, %1, %cst_85 {dimension_numbers = #tpu.dot_dimension_numbers<[1], [0], [0], [1], [0, 0, 1, 1], [], []>} : vector<2x32xf32>, vector<32x256xf32>, vector<2x256xf32> -> vector<2x256xf32>
    %249 = vector.extract_strided_slice %248 {offsets = [0, 0], sizes = [2, 128], strides = [1, 1]} : vector<2x256xf32> to vector<2x128xf32>
    %250 = vector.extract_strided_slice %248 {offsets = [0, 128], sizes = [2, 128], strides = [1, 1]} : vector<2x256xf32> to vector<2x128xf32>
    %c3_86 = arith.constant 3 : index
    %251 = memref.load %arg0[%c3_86] : memref<8xi32, #tpu.memory_space<smem>>
    %c0_i32_87 = arith.constant 0 : i32
    %252 = arith.cmpi sgt, %251, %c0_i32_87 : i32
    %c3_88 = arith.constant 3 : index
    %c0_89 = arith.constant 0 : index
    %c0_90 = arith.constant 0 : index
    %253 = vector.load %arg3[%c3_88, %c0_89, %c0_90] : memref<8x2x128xf32, #tpu.memory_space<vmem>>, vector<1x2x128xf32>
    %254 = vector.shape_cast %253 : vector<1x2x128xf32> to vector<2x128xf32>
    %255 = arith.addf %250, %8 : vector<2x128xf32>
    %256 = arith.select %252, %254, %255 : vector<2x128xf32>
    %257 = arith.addf %249, %256 : vector<2x128xf32>
    %258 = math.tanh %257 : vector<2x128xf32>
    %cst_91 = arith.constant 5.000000e-01 : f32
    %259 = vector.broadcast %cst_91 : f32 to vector<2x128xf32>
    %260 = arith.mulf %259, %258 : vector<2x128xf32>
    %cst_92 = arith.constant 5.000000e-01 : f32
    %261 = vector.broadcast %cst_92 : f32 to vector<2x128xf32>
    %262 = arith.addf %260, %261 : vector<2x128xf32>
    %263 = vector.extract_strided_slice %262 {offsets = [0, 0], sizes = [2, 32], strides = [1, 1]} : vector<2x128xf32> to vector<2x32xf32>
    %264 = vector.extract_strided_slice %262 {offsets = [0, 32], sizes = [2, 32], strides = [1, 1]} : vector<2x128xf32> to vector<2x32xf32>
    %265 = vector.extract_strided_slice %258 {offsets = [0, 64], sizes = [2, 32], strides = [1, 1]} : vector<2x128xf32> to vector<2x32xf32>
    %266 = vector.extract_strided_slice %262 {offsets = [0, 96], sizes = [2, 32], strides = [1, 1]} : vector<2x128xf32> to vector<2x32xf32>
    %267 = arith.mulf %264, %244 : vector<2x32xf32>
    %268 = arith.mulf %263, %265 : vector<2x32xf32>
    %269 = arith.addf %267, %268 : vector<2x32xf32>
    %270 = math.tanh %269 : vector<2x32xf32>
    %271 = arith.mulf %266, %270 : vector<2x32xf32>
    %c8 = arith.constant 8 : index
    %c0_93 = arith.constant 0 : index
    %272 = vector.load %arg10[%c8, %c0_93] : memref<16x32xf32, #tpu.memory_space<vmem>>, vector<2x32xf32>
    tpu.vector_store %arg10[%c8, %c0_93], %271 {strides = array<i32>} : memref<16x32xf32, #tpu.memory_space<vmem>>, vector<2x32xf32>,
    %cst_94 = arith.constant dense<0.000000e+00> : vector<2x256xf32>
    %273 = tpu.matmul %271, %1, %cst_94 {dimension_numbers = #tpu.dot_dimension_numbers<[1], [0], [0], [1], [0, 0, 1, 1], [], []>} : vector<2x32xf32>, vector<32x256xf32>, vector<2x256xf32> -> vector<2x256xf32>
    %274 = vector.extract_strided_slice %273 {offsets = [0, 0], sizes = [2, 128], strides = [1, 1]} : vector<2x256xf32> to vector<2x128xf32>
    %275 = vector.extract_strided_slice %273 {offsets = [0, 128], sizes = [2, 128], strides = [1, 1]} : vector<2x256xf32> to vector<2x128xf32>
    %c4_95 = arith.constant 4 : index
    %276 = memref.load %arg0[%c4_95] : memref<8xi32, #tpu.memory_space<smem>>
    %c0_i32_96 = arith.constant 0 : i32
    %277 = arith.cmpi sgt, %276, %c0_i32_96 : i32
    %c4_97 = arith.constant 4 : index
    %c0_98 = arith.constant 0 : index
    %c0_99 = arith.constant 0 : index
    %278 = vector.load %arg3[%c4_97, %c0_98, %c0_99] : memref<8x2x128xf32, #tpu.memory_space<vmem>>, vector<1x2x128xf32>
    %279 = vector.shape_cast %278 : vector<1x2x128xf32> to vector<2x128xf32>
    %280 = arith.addf %275, %8 : vector<2x128xf32>
    %281 = arith.select %277, %279, %280 : vector<2x128xf32>
    %282 = arith.addf %274, %281 : vector<2x128xf32>
    %283 = math.tanh %282 : vector<2x128xf32>
    %cst_100 = arith.constant 5.000000e-01 : f32
    %284 = vector.broadcast %cst_100 : f32 to vector<2x128xf32>
    %285 = arith.mulf %284, %283 : vector<2x128xf32>
    %cst_101 = arith.constant 5.000000e-01 : f32
    %286 = vector.broadcast %cst_101 : f32 to vector<2x128xf32>
    %287 = arith.addf %285, %286 : vector<2x128xf32>
    %288 = vector.extract_strided_slice %287 {offsets = [0, 0], sizes = [2, 32], strides = [1, 1]} : vector<2x128xf32> to vector<2x32xf32>
    %289 = vector.extract_strided_slice %287 {offsets = [0, 32], sizes = [2, 32], strides = [1, 1]} : vector<2x128xf32> to vector<2x32xf32>
    %290 = vector.extract_strided_slice %283 {offsets = [0, 64], sizes = [2, 32], strides = [1, 1]} : vector<2x128xf32> to vector<2x32xf32>
    %291 = vector.extract_strided_slice %287 {offsets = [0, 96], sizes = [2, 32], strides = [1, 1]} : vector<2x128xf32> to vector<2x32xf32>
    %292 = arith.mulf %289, %269 : vector<2x32xf32>
    %293 = arith.mulf %288, %290 : vector<2x32xf32>
    %294 = arith.addf %292, %293 : vector<2x32xf32>
    %295 = math.tanh %294 : vector<2x32xf32>
    %296 = arith.mulf %291, %295 : vector<2x32xf32>
    %c10 = arith.constant 10 : index
    %c0_102 = arith.constant 0 : index
    %297 = vector.load %arg10[%c10, %c0_102] : memref<16x32xf32, #tpu.memory_space<vmem>>, vector<2x32xf32>
    tpu.vector_store %arg10[%c10, %c0_102], %296 {strides = array<i32>} : memref<16x32xf32, #tpu.memory_space<vmem>>, vector<2x32xf32>,
    %cst_103 = arith.constant dense<0.000000e+00> : vector<2x256xf32>
    %298 = tpu.matmul %296, %1, %cst_103 {dimension_numbers = #tpu.dot_dimension_numbers<[1], [0], [0], [1], [0, 0, 1, 1], [], []>} : vector<2x32xf32>, vector<32x256xf32>, vector<2x256xf32> -> vector<2x256xf32>
    %299 = vector.extract_strided_slice %298 {offsets = [0, 0], sizes = [2, 128], strides = [1, 1]} : vector<2x256xf32> to vector<2x128xf32>
    %300 = vector.extract_strided_slice %298 {offsets = [0, 128], sizes = [2, 128], strides = [1, 1]} : vector<2x256xf32> to vector<2x128xf32>
    %c5_104 = arith.constant 5 : index
    %301 = memref.load %arg0[%c5_104] : memref<8xi32, #tpu.memory_space<smem>>
    %c0_i32_105 = arith.constant 0 : i32
    %302 = arith.cmpi sgt, %301, %c0_i32_105 : i32
    %c5_106 = arith.constant 5 : index
    %c0_107 = arith.constant 0 : index
    %c0_108 = arith.constant 0 : index
    %303 = vector.load %arg3[%c5_106, %c0_107, %c0_108] : memref<8x2x128xf32, #tpu.memory_space<vmem>>, vector<1x2x128xf32>
    %304 = vector.shape_cast %303 : vector<1x2x128xf32> to vector<2x128xf32>
    %305 = arith.addf %300, %8 : vector<2x128xf32>
    %306 = arith.select %302, %304, %305 : vector<2x128xf32>
    %307 = arith.addf %299, %306 : vector<2x128xf32>
    %308 = math.tanh %307 : vector<2x128xf32>
    %cst_109 = arith.constant 5.000000e-01 : f32
    %309 = vector.broadcast %cst_109 : f32 to vector<2x128xf32>
    %310 = arith.mulf %309, %308 : vector<2x128xf32>
    %cst_110 = arith.constant 5.000000e-01 : f32
    %311 = vector.broadcast %cst_110 : f32 to vector<2x128xf32>
    %312 = arith.addf %310, %311 : vector<2x128xf32>
    %313 = vector.extract_strided_slice %312 {offsets = [0, 0], sizes = [2, 32], strides = [1, 1]} : vector<2x128xf32> to vector<2x32xf32>
    %314 = vector.extract_strided_slice %312 {offsets = [0, 32], sizes = [2, 32], strides = [1, 1]} : vector<2x128xf32> to vector<2x32xf32>
    %315 = vector.extract_strided_slice %308 {offsets = [0, 64], sizes = [2, 32], strides = [1, 1]} : vector<2x128xf32> to vector<2x32xf32>
    %316 = vector.extract_strided_slice %312 {offsets = [0, 96], sizes = [2, 32], strides = [1, 1]} : vector<2x128xf32> to vector<2x32xf32>
    %317 = arith.mulf %314, %294 : vector<2x32xf32>
    %318 = arith.mulf %313, %315 : vector<2x32xf32>
    %319 = arith.addf %317, %318 : vector<2x32xf32>
    %320 = math.tanh %319 : vector<2x32xf32>
    %321 = arith.mulf %316, %320 : vector<2x32xf32>
    %c12 = arith.constant 12 : index
    %c0_111 = arith.constant 0 : index
    %322 = vector.load %arg10[%c12, %c0_111] : memref<16x32xf32, #tpu.memory_space<vmem>>, vector<2x32xf32>
    tpu.vector_store %arg10[%c12, %c0_111], %321 {strides = array<i32>} : memref<16x32xf32, #tpu.memory_space<vmem>>, vector<2x32xf32>,
    %cst_112 = arith.constant dense<0.000000e+00> : vector<2x256xf32>
    %323 = tpu.matmul %321, %1, %cst_112 {dimension_numbers = #tpu.dot_dimension_numbers<[1], [0], [0], [1], [0, 0, 1, 1], [], []>} : vector<2x32xf32>, vector<32x256xf32>, vector<2x256xf32> -> vector<2x256xf32>
    %324 = vector.extract_strided_slice %323 {offsets = [0, 0], sizes = [2, 128], strides = [1, 1]} : vector<2x256xf32> to vector<2x128xf32>
    %325 = vector.extract_strided_slice %323 {offsets = [0, 128], sizes = [2, 128], strides = [1, 1]} : vector<2x256xf32> to vector<2x128xf32>
    %c6_113 = arith.constant 6 : index
    %326 = memref.load %arg0[%c6_113] : memref<8xi32, #tpu.memory_space<smem>>
    %c0_i32_114 = arith.constant 0 : i32
    %327 = arith.cmpi sgt, %326, %c0_i32_114 : i32
    %c6_115 = arith.constant 6 : index
    %c0_116 = arith.constant 0 : index
    %c0_117 = arith.constant 0 : index
    %328 = vector.load %arg3[%c6_115, %c0_116, %c0_117] : memref<8x2x128xf32, #tpu.memory_space<vmem>>, vector<1x2x128xf32>
    %329 = vector.shape_cast %328 : vector<1x2x128xf32> to vector<2x128xf32>
    %330 = arith.addf %325, %8 : vector<2x128xf32>
    %331 = arith.select %327, %329, %330 : vector<2x128xf32>
    %332 = arith.addf %324, %331 : vector<2x128xf32>
    %333 = math.tanh %332 : vector<2x128xf32>
    %cst_118 = arith.constant 5.000000e-01 : f32
    %334 = vector.broadcast %cst_118 : f32 to vector<2x128xf32>
    %335 = arith.mulf %334, %333 : vector<2x128xf32>
    %cst_119 = arith.constant 5.000000e-01 : f32
    %336 = vector.broadcast %cst_119 : f32 to vector<2x128xf32>
    %337 = arith.addf %335, %336 : vector<2x128xf32>
    %338 = vector.extract_strided_slice %337 {offsets = [0, 0], sizes = [2, 32], strides = [1, 1]} : vector<2x128xf32> to vector<2x32xf32>
    %339 = vector.extract_strided_slice %337 {offsets = [0, 32], sizes = [2, 32], strides = [1, 1]} : vector<2x128xf32> to vector<2x32xf32>
    %340 = vector.extract_strided_slice %333 {offsets = [0, 64], sizes = [2, 32], strides = [1, 1]} : vector<2x128xf32> to vector<2x32xf32>
    %341 = vector.extract_strided_slice %337 {offsets = [0, 96], sizes = [2, 32], strides = [1, 1]} : vector<2x128xf32> to vector<2x32xf32>
    %342 = arith.mulf %339, %319 : vector<2x32xf32>
    %343 = arith.mulf %338, %340 : vector<2x32xf32>
    %344 = arith.addf %342, %343 : vector<2x32xf32>
    %345 = math.tanh %344 : vector<2x32xf32>
    %346 = arith.mulf %341, %345 : vector<2x32xf32>
    %c14 = arith.constant 14 : index
    %c0_120 = arith.constant 0 : index
    %347 = vector.load %arg10[%c14, %c0_120] : memref<16x32xf32, #tpu.memory_space<vmem>>, vector<2x32xf32>
    tpu.vector_store %arg10[%c14, %c0_120], %346 {strides = array<i32>} : memref<16x32xf32, #tpu.memory_space<vmem>>, vector<2x32xf32>,
    %c0_121 = arith.constant 0 : index
    %c0_122 = arith.constant 0 : index
    %348 = vector.load %arg10[%c0_121, %c0_122] : memref<16x32xf32, #tpu.memory_space<vmem>>, vector<16x32xf32>
    %cst_123 = arith.constant dense<0.000000e+00> : vector<16x32xf32>
    %349 = tpu.matmul %348, %2, %cst_123 {dimension_numbers = #tpu.dot_dimension_numbers<[1], [0], [0], [1], [0, 0, 1, 1], [], []>} : vector<16x32xf32>, vector<32x32xf32>, vector<16x32xf32> -> vector<16x32xf32>
    %350 = arith.addf %349, %11 : vector<16x32xf32>
    %c0_124 = arith.constant 0 : index
    %c0_125 = arith.constant 0 : index
    %351 = vector.load %arg9[%c0_124, %c0_125] : memref<16x32xf32, #tpu.memory_space<vmem>>, vector<16x32xf32>
    tpu.vector_store %arg9[%c0_124, %c0_125], %350 {strides = array<i32>} : memref<16x32xf32, #tpu.memory_space<vmem>>, vector<16x32xf32>,
    return
  }
}

</mosaic_0001>

<bundles_post_ra>
// kernel: seq2seq_lstm.1
= control target key start
LH: loop header
LB: loop body
LE: loop exit
PB: predicated region body
PF: predicated region fallthrough
CT: control target
= control target key end

     0   :  { %14 = vsyncpa [#allocation4], 0  ;;  %s1179_s12 = smov [#allocation3]   ;;  %s1526_s0 = inlined_call_operand.vmem [shape: s32[8], index: 0, kind: input, shape index: {}]   ;;  %s1527_s1 = inlined_call_operand.vmem [shape: f32[8,2,128], index: 1, kind: input, shape index: {}]   ;;  %s1528_s2 = inlined_call_operand.vmem [shape: f32[32,128], index: 2, kind: input, shape index: {}]   ;;  %s1529_s3 = inlined_call_operand.vmem [shape: f32[8,2,128], index: 3, kind: input, shape index: {}]   ;;  %s1530_s4 = inlined_call_operand.vmem [shape: f32[32,256], index: 4, kind: input, shape index: {}]   ;;  %s1531_s5 = inlined_call_operand.vmem [shape: f32[1,128], index: 5, kind: input, shape index: {}]   ;;  %s1532_s6 = inlined_call_operand.vmem [shape: f32[1,128], index: 6, kind: input, shape index: {}]   ;;  %s1533_s7 = inlined_call_operand.vmem [shape: f32[32,32], index: 7, kind: input, shape index: {}]   ;;  %s1534_s8 = inlined_call_operand.vmem [shape: f32[1,32], index: 8, kind: input, shape index: {}]   ;;  %s1535_s9 = inlined_call_operand.vmem [shape: f32[16,32], index: 9, kind: output, shape index: {}]  }
   0x1   :  { %s20_s11 = sshll.u32 %s1526_s0, 4  ;;  %s21_s11 = int_to_ptr.vmem [resolvable:$true] %s20_s11 }
   0x2   :  { %23 = dma.vmem_to_smem %s21_s11, 16, %s1179_s12, [#allocation4]  }
   0x3   :  { %1177 = dma.done.wait [#allocation4], 16  }
   0x4   :  { %1178 = vsyncadd [#allocation4], 4294967280 }
   0x5   :  { %44 = sfence }
   0x6   :  { %v73_v0 = vld [vmem:[%s1527_s1] sm:$0x3]  ;;  %s1180_s15 = smov 64   ;;  %s1181_s0 = smov 32   ;;  %v48_v10 = vld [vmem:[%s1528_s2 + $0x18] sm:$0xff]  ;;  %v47_v11 = vld [vmem:[%s1528_s2 + $0x10] sm:$0xff] }
   0x7   :  { %1101 = vtanh.f32 %v73_v0  ;;  %114 = vmatpush.msra.mxu0 %v48_v10  ;;  %161 = vmatpush.msra.mxu1 %v48_v10  ;;  %v46_v12 = vld [vmem:[%s1528_s2 + $0x8] sm:$0xff]  ;;  %v45_v15 = vld [vmem:[%s1528_s2] sm:$0xff]  ;;  %vm99_vm0 = vcmask 261120   ;;  %vm474_vm1 = vcmask 254976   ;;  %s1075_s19 = sld [smem:[#allocation3 + $0x2]] }
   0x8   :  { %208 = vmatpush.msra.mxu3 %v48_v10  ;;  %396 = vmatpush.msra.mxu2 %v48_v10  ;;  %v1052_v17 = vld [vmem:[%s1527_s1 + $0x2] sm:$0x3]  ;;  %v1054_v32 = vld [vmem:[%s1527_s1 + $0x4] sm:$0x3]  ;;  %v1056_v47 = vld [vmem:[%s1527_s1 + $0x6] sm:$0x3] }
   0x9   :  { %115 = vmatpush.msra.mxu0 %v47_v11  ;;  %162 = vmatpush.msra.mxu1 %v47_v11  ;;  %v1058_v62 = vld [vmem:[%s1527_s1 + $0x8] sm:$0x3]  ;;  %s1079_s23 = sld [smem:[#allocation3 + $0x3]] }
   0xa   :  { %209 = vmatpush.msra.mxu3 %v47_v11  ;;  %397 = vmatpush.msra.mxu2 %v47_v11  ;;  %s1083_s25 = sld [smem:[#allocation3 + $0x4]] }
   0xb   :  { %116 = vmatpush.msra.mxu0 %v46_v12  ;;  %163 = vmatpush.msra.mxu1 %v46_v12  ;;  %s1087_s16 = sld [smem:[#allocation3 + $0x5]] }
   0xc   :  { %210 = vmatpush.msra.mxu3 %v46_v12  ;;  %398 = vmatpush.msra.mxu2 %v46_v12 }
   0xd   :  { %v1102_v1 = vpop.eup %1101  ;;  %117 = vmatpush.msra.mxu0 %v45_v15  ;;  %164 = vmatpush.msra.mxu1 %v45_v15  ;;  %p672_p2 = scmp.gt.s32.totalorder %s1075_s19, 0 }
   0xe   :  { %79 = vrot.lane.b32.xlu0 %v1102_v1, %s1180_s15  ;;  %v75_v2 = vmul.f32 0.5, %v1102_v1  ;;  %211 = vmatpush.msra.mxu3 %v45_v15 }
   0xf   :  { %302 = vmatpush.msrb.mxu0 %v48_v10  ;;  %349 = vmatpush.msrb.mxu1 %v48_v10  ;;  %s676_s20 = scalar_select %p672_p2, 1, 0 }
  0x10   :  { %v76_v3 = vadd.f32 0.5, %v75_v2  ;;  %255 = vmatpush.msrb.mxu3 %v48_v10  ;;  %399 = vmatpush.msra.mxu2 %v45_v15  ;;  %p749_p3 = scmp.gt.s32.totalorder %s1079_s23, 0  ;;  %p826_p4 = scmp.gt.s32.totalorder %s1083_s25, 0 }
  0x11   :  { %303 = vmatpush.msrb.mxu0 %v47_v11  ;;  %350 = vmatpush.msrb.mxu1 %v47_v11  ;;  %p903_p5 = scmp.gt.s32.totalorder %s1087_s16, 0 }
  0x12   :  { %v77_v6 = vmul.f32 0.0, %v76_v3  ;;  %256 = vmatpush.msrb.mxu3 %v47_v11  ;;  %s753_s2 = scalar_select %p749_p3, 1, 0 }
  0x13   :  { %304 = vmatpush.msrb.mxu0 %v46_v12  ;;  %351 = vmatpush.msrb.mxu1 %v46_v12  ;;  %s830_s26 = scalar_select %p826_p4, 1, 0 }
  0x14   :  { %257 = vmatpush.msrb.mxu3 %v46_v12 }
  0x15   :  { %305 = vmatpush.msrb.mxu0 %v45_v15  ;;  %352 = vmatpush.msrb.mxu1 %v45_v15 }
  0x16   :  { %258 = vmatpush.msrb.mxu3 %v45_v15 }
  0x80   :  { %v80_v4 = vpop.permute.xlu0 %79 }
  0x81   :  { %v82_v5 = vmul.f32 %v80_v4, %v76_v3 }
  0x83   :  { %84 = vrot.lane.b32.xlu0 %v82_v5, %s1181_s0 }
  0xf5   :  { %v85_v7 = vpop.permute.xlu0 %84 }
  0xf6   :  { %v87_v8 = vadd.f32 %v85_v7, %v77_v6 }
  0xf8   :  { %1103 = vtanh.f32 %v87_v8 }
  0xfe   :  { %v1104_v9 = vpop.eup %1103 }
  0xff   :  { %90 = vrot.lane.b32.xlu1 %v1104_v9, %s1180_s15 }
 0x171   :  { %v91_v13 = vpop.permute.xlu1 %90 }
 0x172   :  { %v93_v14 = vmul.f32 %v91_v13, %v76_v3  ;;  %v1060_v13 = vld [vmem:[%s1527_s1 + $0xa] sm:$0x3] }
 0x174   :  { %97 = vrot.lane.b32.xlu1 %v93_v14, %s1181_s0 }
 0x1e6   :  { %v98_v16 = vpop.permute.xlu1 %97 }
 0x1e7   :  { %1053 = vmatmul.msk.f32.vlgmr.msra.gmra.mxu0 %vm99_vm0, %v98_v16 }
 0x264   :  { %v119_v18 = vpop.f32.mrf.mxu0 }
 0x265   :  { %v120_v19 = vadd.f32 %v1052_v17, %v119_v18 }
 0x267   :  { %1105 = vtanh.f32 %v120_v19 }
 0x26d   :  { %v1106_v20 = vpop.eup %1105 }
 0x26e   :  { %127 = vrot.lane.b32.xlu2 %v1106_v20, %s1180_s15  ;;  %v123_v21 = vmul.f32 0.5, %v1106_v20 }
 0x270   :  { %v124_v22 = vadd.f32 0.5, %v123_v21 }
 0x272   :  { %v125_v25 = vmul.f32 %v124_v22, %v87_v8 }
 0x2c8   :  { %v128_v23 = vpop.permute.xlu2 %127 }
 0x2c9   :  { %v130_v24 = vmul.f32 %v128_v23, %v124_v22 }
 0x2cb   :  { %132 = vrot.lane.b32.xlu2 %v130_v24, %s1181_s0 }
 0x325   :  { %v133_v26 = vpop.permute.xlu2 %132 }
 0x326   :  { %v135_v27 = vadd.f32 %v133_v26, %v125_v25 }
 0x328   :  { %1107 = vtanh.f32 %v135_v27 }
 0x32e   :  { %v1108_v28 = vpop.eup %1107 }
 0x32f   :  { %138 = vrot.lane.b32.xlu0 %v1108_v28, %s1180_s15  ;;  %v1062_v28 = vld [vmem:[%s1527_s1 + $0xc] sm:$0x3] }
 0x3a1   :  { %v139_v29 = vpop.permute.xlu0 %138 }
 0x3a2   :  { %v141_v30 = vmul.f32 %v139_v29, %v124_v22 }
 0x3a4   :  { %145 = vrot.lane.b32.xlu1 %v141_v30, %s1181_s0 }
 0x416   :  { %v146_v31 = vpop.permute.xlu1 %145 }
 0x417   :  { %1055 = vmatmul.msk.f32.vlgmr.msra.gmra.mxu1 %vm99_vm0, %v146_v31 }
 0x494   :  { %v166_v33 = vpop.f32.mrf.mxu1 }
 0x495   :  { %v167_v34 = vadd.f32 %v1054_v32, %v166_v33 }
 0x497   :  { %1109 = vtanh.f32 %v167_v34 }
 0x49d   :  { %v1110_v35 = vpop.eup %1109 }
 0x49e   :  { %174 = vrot.lane.b32.xlu2 %v1110_v35, %s1180_s15  ;;  %v170_v36 = vmul.f32 0.5, %v1110_v35 }
 0x4a0   :  { %v171_v37 = vadd.f32 0.5, %v170_v36 }
 0x4a2   :  { %v172_v40 = vmul.f32 %v171_v37, %v135_v27 }
 0x4f8   :  { %v175_v38 = vpop.permute.xlu2 %174 }
 0x4f9   :  { %v177_v39 = vmul.f32 %v175_v38, %v171_v37 }
 0x4fb   :  { %179 = vrot.lane.b32.xlu0 %v177_v39, %s1181_s0 }
 0x56d   :  { %v180_v41 = vpop.permute.xlu0 %179 }
 0x56e   :  { %v182_v42 = vadd.f32 %v180_v41, %v172_v40 }
 0x570   :  { %1111 = vtanh.f32 %v182_v42 }
 0x576   :  { %v1112_v43 = vpop.eup %1111 }
 0x577   :  { %185 = vrot.lane.b32.xlu1 %v1112_v43, %s1180_s15  ;;  %v1064_v43 = vld [vmem:[%s1527_s1 + $0xe] sm:$0x3] }
 0x5e9   :  { %v186_v44 = vpop.permute.xlu1 %185 }
 0x5ea   :  { %v188_v45 = vmul.f32 %v186_v44, %v171_v37 }
 0x5ec   :  { %192 = vrot.lane.b32.xlu2 %v188_v45, %s1181_s0 }
 0x646   :  { %v193_v46 = vpop.permute.xlu2 %192 }
 0x647   :  { %1057 = vmatmul.msk.f32.vlgmr.msra.gmra.mxu3 %vm99_vm0, %v193_v46 }
 0x6ca   :  { %v213_v48 = vpop.f32.mrf.mxu3 }
 0x6cb   :  { %v214_v49 = vadd.f32 %v1056_v47, %v213_v48 }
 0x6cd   :  { %1113 = vtanh.f32 %v214_v49 }
 0x6d3   :  { %v1114_v50 = vpop.eup %1113 }
 0x6d4   :  { %221 = vrot.lane.b32.xlu0 %v1114_v50, %s1180_s15  ;;  %v217_v51 = vmul.f32 0.5, %v1114_v50 }
 0x6d6   :  { %v218_v52 = vadd.f32 0.5, %v217_v51 }
 0x6d8   :  { %v219_v55 = vmul.f32 %v218_v52, %v182_v42 }
 0x746   :  { %v222_v53 = vpop.permute.xlu0 %221 }
 0x747   :  { %v224_v54 = vmul.f32 %v222_v53, %v218_v52 }
 0x749   :  { %226 = vrot.lane.b32.xlu1 %v224_v54, %s1181_s0 }
 0x7bb   :  { %v227_v56 = vpop.permute.xlu1 %226 }
 0x7bc   :  { %v229_v57 = vadd.f32 %v227_v56, %v219_v55  ;;  %v1312_v55 = vld [vmem:[%s1530_s4 + $0x30] sm:$0xff]  ;;  %v1317_v56 = vld [vmem:[%s1530_s4 + $0x20] sm:$0xff] }
 0x7bd   :  { %441 = vmatpush.msra.mxu3 %v1312_v55  ;;  %490 = vmatpush.msra.mxu0 %v1312_v55 }
 0x7be   :  { %1115 = vtanh.f32 %v229_v57  ;;  %566 = vmatpush.msrb.mxu2 %v1312_v55 }
 0x7bf   :  { %442 = vmatpush.msra.mxu3 %v1317_v56  ;;  %491 = vmatpush.msra.mxu0 %v1317_v56 }
 0x7c0   :  { %567 = vmatpush.msrb.mxu2 %v1317_v56 }
 0x7c4   :  { %v1116_v58 = vpop.eup %1115 }
 0x7c5   :  { %232 = vrot.lane.b32.xlu2 %v1116_v58, %s1180_s15  ;;  %v1332_v58 = vld [vmem:[%s1530_s4] sm:$0xff] }
 0x81f   :  { %v233_v59 = vpop.permute.xlu2 %232 }
 0x820   :  { %v235_v60 = vmul.f32 %v233_v59, %v218_v52 }
 0x822   :  { %239 = vrot.lane.b32.xlu0 %v235_v60, %s1181_s0 }
 0x894   :  { %v240_v61 = vpop.permute.xlu0 %239 }
 0x895   :  { %1059 = vmatmul.msk.f32.vlgmr.msrb.gmra.mxu3 %vm99_vm0, %v240_v61 }
 0x918   :  { %v260_v63 = vpop.f32.mrf.mxu3 }
 0x919   :  { %v261_v0 = vadd.f32 %v1058_v62, %v260_v63  ;;  %v1098_v62 = vld [vmem:[%s1531_s5] ss:$0 sm:$0xff] }
 0x91b   :  { %1117 = vtanh.f32 %v261_v0 }
 0x921   :  { %v1118_v1 = vpop.eup %1117 }
 0x922   :  { %268 = vrot.lane.b32.xlu1 %v1118_v1, %s1180_s15  ;;  %v264_v2 = vmul.f32 0.5, %v1118_v1 }
 0x924   :  { %v265_v3 = vadd.f32 0.5, %v264_v2 }
 0x926   :  { %v266_v6 = vmul.f32 %v265_v3, %v229_v57  ;;  %v1324_v57 = vld [vmem:[%s1530_s4 + $0x10] sm:$0xff] }
 0x927   :  { %443 = vmatpush.msra.mxu3 %v1324_v57  ;;  %492 = vmatpush.msra.mxu0 %v1324_v57 }
 0x928   :  { %568 = vmatpush.msrb.mxu2 %v1324_v57 }
 0x929   :  { %444 = vmatpush.msra.mxu3 %v1332_v58  ;;  %493 = vmatpush.msra.mxu0 %v1332_v58 }
 0x92a   :  { %569 = vmatpush.msrb.mxu2 %v1332_v58 }
 0x994   :  { %v269_v4 = vpop.permute.xlu1 %268 }
 0x995   :  { %v271_v5 = vmul.f32 %v269_v4, %v265_v3 }
 0x997   :  { %273 = vrot.lane.b32.xlu2 %v271_v5, %s1181_s0 }
 0x9f1   :  { %v274_v7 = vpop.permute.xlu2 %273 }
 0x9f2   :  { %v276_v8 = vadd.f32 %v274_v7, %v266_v6 }
 0x9f4   :  { %1119 = vtanh.f32 %v276_v8 }
 0x9fa   :  { %v1120_v9 = vpop.eup %1119 }
 0x9fb   :  { %279 = vrot.lane.b32.xlu0 %v1120_v9, %s1180_s15 }
 0xa6d   :  { %v280_v10 = vpop.permute.xlu0 %279 }
 0xa6e   :  { %v282_v11 = vmul.f32 %v280_v10, %v265_v3  ;;  %v1360_v10 = vld [vmem:[%s1530_s4 + $0x38] sm:$0xff] }
 0xa6f   :  { %510 = vmatpush.msra.mxu1 %v1360_v10  ;;  %586 = vmatpush.msrb.mxu3 %v1360_v10 }
 0xa70   :  { %286 = vrot.lane.b32.xlu1 %v282_v11, %s1181_s0  ;;  %v1365_v11 = vld [vmem:[%s1530_s4 + $0x28] sm:$0xff] }
 0xa71   :  { %511 = vmatpush.msra.mxu1 %v1365_v11  ;;  %587 = vmatpush.msrb.mxu3 %v1365_v11 }
 0xae2   :  { %v287_v12 = vpop.permute.xlu1 %286 }
 0xae3   :  { %1061 = vmatmul.msk.f32.vlgmr.msrb.gmra.mxu0 %vm99_vm0, %v287_v12  ;;  %v1372_v12 = vld [vmem:[%s1530_s4 + $0x18] sm:$0xff] }
 0xae4   :  { %643 = vmatpush.msrb.mxu0 %v1312_v55  ;;  %512 = vmatpush.msra.mxu1 %v1372_v12 }
 0xae5   :  { %588 = vmatpush.msrb.mxu3 %v1372_v12 }
 0xae6   :  { %644 = vmatpush.msrb.mxu0 %v1317_v56 }
 0xae8   :  { %645 = vmatpush.msrb.mxu0 %v1324_v57 }
 0xaea   :  { %646 = vmatpush.msrb.mxu0 %v1332_v58 }
 0xb60   :  { %v307_v14 = vpop.f32.mrf.mxu0 }
 0xb61   :  { %v308_v15 = vadd.f32 %v1060_v13, %v307_v14  ;;  %v1379_v13 = vld [vmem:[%s1530_s4 + $0x8] sm:$0xff]  ;;  %s518_s4 = sld [smem:[#allocation3]] }
 0xb62   :  { %513 = vmatpush.msra.mxu1 %v1379_v13  ;;  %589 = vmatpush.msrb.mxu3 %v1379_v13 }
 0xb63   :  { %1121 = vtanh.f32 %v308_v15 }
 0xb67   :  { %p519_p0 = scmp.gt.s32.totalorder %s518_s4, 0 }
 0xb69   :  { %v1122_v16 = vpop.eup %1121  ;;  %s522_s11 = scalar_select %p519_p0, 1, 0 }
 0xb6a   :  { %315 = vrot.lane.b32.xlu2 %v1122_v16, %s1180_s15  ;;  %v311_v17 = vmul.f32 0.5, %v1122_v16 }
 0xb6c   :  { %v312_v18 = vadd.f32 0.5, %v311_v17  ;;  %v1408_v17 = vld [vmem:[%s1532_s6] ss:$0 sm:$0xff]  ;;  %s1071_s6 = sld [smem:[#allocation3 + $0x1]] }
 0xb6e   :  { %v313_v21 = vmul.f32 %v312_v18, %v276_v8 }
 0xb72   :  { %p595_p1 = scmp.gt.s32.totalorder %s1071_s6, 0 }
 0xb73   :  { %s907_s6 = scalar_select %p903_p5, 1, 0 }
 0xb74   :  { %s599_s1 = scalar_select %p595_p1, 1, 0 }
 0xbc4   :  { %v316_v19 = vpop.permute.xlu2 %315 }
 0xbc5   :  { %v318_v20 = vmul.f32 %v316_v19, %v312_v18 }
 0xbc7   :  { %320 = vrot.lane.b32.xlu0 %v318_v20, %s1181_s0  ;;  %v520_v20 = vld [vmem:[%s1529_s3] sm:$0x3] }
 0xc39   :  { %v321_v22 = vpop.permute.xlu0 %320 }
 0xc3a   :  { %v323_v23 = vadd.f32 %v321_v22, %v313_v21 }
 0xc3c   :  { %1123 = vtanh.f32 %v323_v23 }
 0xc42   :  { %v1124_v24 = vpop.eup %1123 }
 0xc43   :  { %326 = vrot.lane.b32.xlu1 %v1124_v24, %s1180_s15 }
 0xcb5   :  { %v327_v25 = vpop.permute.xlu1 %326 }
 0xcb6   :  { %v329_v26 = vmul.f32 %v327_v25, %v312_v18  ;;  %v523_v18 = vstv %s522_s11 }
 0xcb7   :  { %vm524_vm2 = vcmp.eq.s32.totalorder %v523_v18, 1 }
 0xcb8   :  { %333 = vrot.lane.b32.xlu2 %v329_v26, %s1181_s0 }
 0xd12   :  { %v334_v27 = vpop.permute.xlu2 %333 }
 0xd13   :  { %1063 = vmatmul.msk.f32.vlgmr.msrb.gmra.mxu1 %vm99_vm0, %v334_v27 }
 0xd14   :  { %663 = vmatpush.msrb.mxu1 %v1360_v10 }
 0xd16   :  { %664 = vmatpush.msrb.mxu1 %v1365_v11 }
 0xd18   :  { %665 = vmatpush.msrb.mxu1 %v1372_v12 }
 0xd1a   :  { %666 = vmatpush.msrb.mxu1 %v1379_v13 }
 0xd90   :  { %v354_v29 = vpop.f32.mrf.mxu1 }
 0xd91   :  { %v355_v30 = vadd.f32 %v1062_v28, %v354_v29 }
 0xd93   :  { %1125 = vtanh.f32 %v355_v30 }
 0xd99   :  { %v1126_v31 = vpop.eup %1125 }
 0xd9a   :  { %362 = vrot.lane.b32.xlu0 %v1126_v31, %s1180_s15  ;;  %v358_v32 = vmul.f32 0.5, %v1126_v31 }
 0xd9c   :  { %v359_v33 = vadd.f32 0.5, %v358_v32 }
 0xd9e   :  { %v360_v36 = vmul.f32 %v359_v33, %v323_v23 }
 0xe0c   :  { %v363_v34 = vpop.permute.xlu0 %362 }
 0xe0d   :  { %v365_v35 = vmul.f32 %v363_v34, %v359_v33 }
 0xe0f   :  { %367 = vrot.lane.b32.xlu1 %v365_v35, %s1181_s0 }
 0xe81   :  { %v368_v37 = vpop.permute.xlu1 %367 }
 0xe82   :  { %v370_v38 = vadd.f32 %v368_v37, %v360_v36  ;;  %v600_v37 = vstv %s599_s1 }
 0xe83   :  { %vm601_vm3 = vcmp.eq.s32.totalorder %v600_v37, 1 }
 0xe84   :  { %1127 = vtanh.f32 %v370_v38 }
 0xe8a   :  { %v1128_v39 = vpop.eup %1127 }
 0xe8b   :  { %373 = vrot.lane.b32.xlu2 %v1128_v39, %s1180_s15  ;;  %v1072_v39 = vld [vmem:[%s1529_s3 + $0x2] sm:$0x3] }
 0xee5   :  { %v374_v40 = vpop.permute.xlu2 %373 }
 0xee6   :  { %v376_v41 = vmul.f32 %v374_v40, %v359_v33 }
 0xee8   :  { %380 = vrot.lane.b32.xlu0 %v376_v41, %s1181_s0 }
 0xf5a   :  { %v381_v42 = vpop.permute.xlu0 %380 }
 0xf5b   :  { %1065 = vmatmul.msk.f32.vlgmr.msra.gmra.mxu2 %vm99_vm0, %v381_v42 }
 0xf5c   :  { %720 = vmatpush.msra.mxu2 %v1312_v55 }
 0xf5e   :  { %721 = vmatpush.msra.mxu2 %v1317_v56 }
 0xf60   :  { %722 = vmatpush.msra.mxu2 %v1324_v57 }
 0xf62   :  { %723 = vmatpush.msra.mxu2 %v1332_v58 }
 0xfde   :  { %v401_v44 = vpop.f32.mrf.mxu2 }
 0xfdf   :  { %v402_v45 = vadd.f32 %v1064_v43, %v401_v44 }
 0xfe1   :  { %1129 = vtanh.f32 %v402_v45 }
 0xfe7   :  { %v1130_v46 = vpop.eup %1129 }
 0xfe8   :  { %409 = vrot.lane.b32.xlu1 %v1130_v46, %s1180_s15  ;;  %v405_v47 = vmul.f32 0.5, %v1130_v46 }
 0xfea   :  { %v406_v48 = vadd.f32 0.5, %v405_v47 }
 0xfec   :  { %v407_v51 = vmul.f32 %v406_v48, %v370_v38 }
0x105a   :  { %v410_v49 = vpop.permute.xlu1 %409 }
0x105b   :  { %v412_v50 = vmul.f32 %v410_v49, %v406_v48 }
0x105d   :  { %414 = vrot.lane.b32.xlu2 %v412_v50, %s1181_s0 }
0x10b7   :  { %v415_v52 = vpop.permute.xlu2 %414 }
0x10b8   :  { %v417_v53 = vadd.f32 %v415_v52, %v407_v51 }
0x10ba   :  { %1131 = vtanh.f32 %v417_v53 }
0x10c0   :  { %v1132_v54 = vpop.eup %1131 }
0x10c1   :  { %420 = vrot.lane.b32.xlu0 %v1132_v54, %s1180_s15 }
0x1133   :  { %v421_v59 = vpop.permute.xlu0 %420 }
0x1134   :  { %v423_v60 = vmul.f32 %v421_v59, %v406_v48 }
0x1136   :  { %425 = vrot.lane.b32.xlu1 %v423_v60, %s1181_s0  ;;  %v677_v60 = vstv %s676_s20 }
0x1137   :  { %vm678_vm4 = vcmp.eq.s32.totalorder %v677_v60, 1 }
0x11a8   :  { %v426_v61 = vpop.permute.xlu1 %425 }
0x11a9   :  { %1066 = vmatmul.msk.f32.vlgmr.msra.gmra.mxu3 %vm99_vm0, %v426_v61 }
0x11aa   :  { %740 = vmatpush.msra.mxu3 %v1360_v10 }
0x11ac   :  { %741 = vmatpush.msra.mxu3 %v1365_v11 }
0x11ae   :  { %742 = vmatpush.msra.mxu3 %v1372_v12 }
0x11b0   :  { %743 = vmatpush.msra.mxu3 %v1379_v13 }
0x122c   :  { %v446_v63 = vpop.f32.mrf.mxu3 }
0x122d   :  { %v449_v0 = vadd.f32 %v1098_v62, %v446_v63 }
0x122f   :  { %1133 = vtanh.f32 %v449_v0 }
0x1235   :  { %v1134_v1 = vpop.eup %1133 }
0x1236   :  { %455 = vrot.lane.b32.xlu2 %v1134_v1, %s1180_s15  ;;  %v451_v2 = vmul.f32 0.5, %v1134_v1 }
0x1238   :  { %v452_v3 = vadd.f32 0.5, %v451_v2 }
0x123a   :  { %v453_v6 = vmul.f32 %v452_v3, %v417_v53 }
0x1290   :  { %v456_v4 = vpop.permute.xlu2 %455 }
0x1291   :  { %v458_v5 = vmul.f32 %v456_v4, %v452_v3 }
0x1293   :  { %460 = vrot.lane.b32.xlu0 %v458_v5, %s1181_s0 }
0x1305   :  { %v461_v7 = vpop.permute.xlu0 %460 }
0x1306   :  { %v463_v8 = vadd.f32 %v461_v7, %v453_v6 }
0x1308   :  { %1135 = vtanh.f32 %v463_v8 }
0x130e   :  { %v1136_v9 = vpop.eup %1135 }
0x130f   :  { %466 = vrot.lane.b32.xlu1 %v1136_v9, %s1180_s15 }
0x1381   :  { %v467_v14 = vpop.permute.xlu1 %466 }
0x1382   :  { %v469_v15 = vmul.f32 %v467_v14, %v452_v3 }
0x1384   :  { %471 = vrot.lane.b32.xlu2 %v469_v15, %s1181_s0 }
0x13de   :  { %v472_v16 = vpop.permute.xlu2 %471 }
0x13df   :  { %475 = vst.msk [vmem:[#allocation2] sm:$0x3] %vm474_vm1, %v472_v16  ;;  %1067 = vmatmul.msk.f32.vlgmr.msra.gmra.mxu0 %vm99_vm0, %v472_v16  ;;  %1068 = vmatmul.msk.f32.vlgmr.msra.gmra.mxu1 %vm99_vm0, %v472_v16 }
0x13e0   :  { %817 = vmatpush.msra.mxu1 %v1360_v10  ;;  %797 = vmatpush.msra.mxu0 %v1312_v55 }
0x13e2   :  { %818 = vmatpush.msra.mxu1 %v1365_v11  ;;  %798 = vmatpush.msra.mxu0 %v1317_v56 }
0x13e4   :  { %819 = vmatpush.msra.mxu1 %v1372_v12  ;;  %799 = vmatpush.msra.mxu0 %v1324_v57 }
0x13e6   :  { %820 = vmatpush.msra.mxu1 %v1379_v13  ;;  %800 = vmatpush.msra.mxu0 %v1332_v58 }
0x145c   :  { %v515_v19 = vpop.f32.mrf.mxu1  ;;  %v495_v22 = vpop.f32.mrf.mxu0 }
0x145d   :  { %v521_v21 = vadd.f32 %v1408_v17, %v515_v19 }
0x145f   :  { %v525_v23 = vsel %vm524_vm2, %v520_v20, %v521_v21 }
0x1460   :  { %v526_v24 = vadd.f32 %v525_v23, %v495_v22 }
0x1462   :  { %1137 = vtanh.f32 %v526_v24 }
0x1468   :  { %v1138_v25 = vpop.eup %1137 }
0x1469   :  { %532 = vrot.lane.b32.xlu0 %v1138_v25, %s1180_s15  ;;  %v528_v26 = vmul.f32 0.5, %v1138_v25 }
0x146b   :  { %v529_v27 = vadd.f32 0.5, %v528_v26 }
0x146d   :  { %v530_v30 = vmul.f32 %v529_v27, %v463_v8 }
0x14db   :  { %v533_v28 = vpop.permute.xlu0 %532 }
0x14dc   :  { %v535_v29 = vmul.f32 %v533_v28, %v529_v27 }
0x14de   :  { %537 = vrot.lane.b32.xlu1 %v535_v29, %s1181_s0 }
0x1550   :  { %v538_v31 = vpop.permute.xlu1 %537 }
0x1551   :  { %v540_v32 = vadd.f32 %v538_v31, %v530_v30  ;;  %v831_v31 = vstv %s830_s26 }
0x1552   :  { %vm832_vm6 = vcmp.eq.s32.totalorder %v831_v31, 1 }
0x1553   :  { %1139 = vtanh.f32 %v540_v32 }
0x1559   :  { %v1140_v33 = vpop.eup %1139 }
0x155a   :  { %543 = vrot.lane.b32.xlu2 %v1140_v33, %s1180_s15  ;;  %v1084_v33 = vld [vmem:[%s1529_s3 + $0x8] sm:$0x3] }
0x15b4   :  { %v544_v34 = vpop.permute.xlu2 %543 }
0x15b5   :  { %v546_v35 = vmul.f32 %v544_v34, %v529_v27 }
0x15b7   :  { %548 = vrot.lane.b32.xlu0 %v546_v35, %s1181_s0 }
0x1629   :  { %v549_v36 = vpop.permute.xlu0 %548 }
0x162a   :  { %551 = vst.msk [vmem:[#allocation2 + $0x2] sm:$0x3] %vm474_vm1, %v549_v36  ;;  %1069 = vmatmul.msk.f32.vlgmr.msrb.gmra.mxu2 %vm99_vm0, %v549_v36  ;;  %1070 = vmatmul.msk.f32.vlgmr.msrb.gmra.mxu3 %vm99_vm0, %v549_v36 }
0x162b   :  { %894 = vmatpush.msrb.mxu3 %v1360_v10  ;;  %874 = vmatpush.msrb.mxu2 %v1312_v55 }
0x162d   :  { %895 = vmatpush.msrb.mxu3 %v1365_v11  ;;  %875 = vmatpush.msrb.mxu2 %v1317_v56 }
0x162f   :  { %896 = vmatpush.msrb.mxu3 %v1372_v12  ;;  %876 = vmatpush.msrb.mxu2 %v1324_v57 }
0x1631   :  { %897 = vmatpush.msrb.mxu3 %v1379_v13  ;;  %877 = vmatpush.msrb.mxu2 %v1332_v58 }
0x16ad   :  { %v591_v38 = vpop.f32.mrf.mxu3  ;;  %v571_v41 = vpop.f32.mrf.mxu2 }
0x16ae   :  { %v598_v40 = vadd.f32 %v1408_v17, %v591_v38 }
0x16b0   :  { %v602_v42 = vsel %vm601_vm3, %v1072_v39, %v598_v40 }
0x16b1   :  { %v603_v43 = vadd.f32 %v602_v42, %v571_v41 }
0x16b3   :  { %1141 = vtanh.f32 %v603_v43 }
0x16b9   :  { %v1142_v44 = vpop.eup %1141 }
0x16ba   :  { %609 = vrot.lane.b32.xlu1 %v1142_v44, %s1180_s15  ;;  %v605_v45 = vmul.f32 0.5, %v1142_v44 }
0x16bc   :  { %v606_v46 = vadd.f32 0.5, %v605_v45 }
0x16be   :  { %v607_v49 = vmul.f32 %v606_v46, %v540_v32 }
0x172c   :  { %v610_v47 = vpop.permute.xlu1 %609 }
0x172d   :  { %v612_v48 = vmul.f32 %v610_v47, %v606_v46 }
0x172f   :  { %614 = vrot.lane.b32.xlu2 %v612_v48, %s1181_s0 }
0x1789   :  { %v615_v50 = vpop.permute.xlu2 %614 }
0x178a   :  { %v617_v51 = vadd.f32 %v615_v50, %v607_v49  ;;  %v60_v49 = vld [vmem:[%s1533_s7 + $0x18] sm:$0xff]  ;;  %v59_v50 = vld [vmem:[%s1533_s7 + $0x10] sm:$0xff] }
0x178c   :  { %1143 = vtanh.f32 %v617_v51 }
0x1792   :  { %v1144_v52 = vpop.eup %1143 }
0x1793   :  { %620 = vrot.lane.b32.xlu0 %v1144_v52, %s1180_s15  ;;  %v57_v52 = vld [vmem:[%s1533_s7] sm:$0xff] }
0x1805   :  { %v621_v53 = vpop.permute.xlu0 %620 }
0x1806   :  { %v623_v54 = vmul.f32 %v621_v53, %v606_v46 }
0x1808   :  { %625 = vrot.lane.b32.xlu1 %v623_v54, %s1181_s0 }
0x187a   :  { %v626_v59 = vpop.permute.xlu1 %625 }
0x187b   :  { %628 = vst.msk [vmem:[#allocation2 + $0x4] sm:$0x3] %vm474_vm1, %v626_v59  ;;  %1073 = vmatmul.msk.f32.vlgmr.msrb.gmra.mxu0 %vm99_vm0, %v626_v59  ;;  %1074 = vmatmul.msk.f32.vlgmr.msrb.gmra.mxu1 %vm99_vm0, %v626_v59  ;;  %v908_v59 = vstv %s907_s6 }
0x187c   :  { %971 = vmatpush.msrb.mxu1 %v1360_v10  ;;  %951 = vmatpush.msrb.mxu0 %v1312_v55  ;;  %v1076_v55 = vld [vmem:[%s1529_s3 + $0x4] sm:$0x3]  ;;  %vm909_vm7 = vcmp.eq.s32.totalorder %v908_v59, 1 }
0x187e   :  { %972 = vmatpush.msrb.mxu1 %v1365_v11  ;;  %952 = vmatpush.msrb.mxu0 %v1317_v56  ;;  %v754_v11 = vstv %s753_s2 }
0x187f   :  { %vm755_vm5 = vcmp.eq.s32.totalorder %v754_v11, 1 }
0x1880   :  { %973 = vmatpush.msrb.mxu1 %v1372_v12  ;;  %953 = vmatpush.msrb.mxu0 %v1324_v57 }
0x1882   :  { %974 = vmatpush.msrb.mxu1 %v1379_v13  ;;  %954 = vmatpush.msrb.mxu0 %v1332_v58  ;;  %v1080_v13 = vld [vmem:[%s1529_s3 + $0x6] sm:$0x3] }
0x18f8   :  { %v668_v61 = vpop.f32.mrf.mxu1  ;;  %v648_v62 = vpop.f32.mrf.mxu0 }
0x18f9   :  { %v675_v56 = vadd.f32 %v1408_v17, %v668_v61 }
0x18fb   :  { %v679_v63 = vsel %vm678_vm4, %v1076_v55, %v675_v56  ;;  %v1088_v55 = vld [vmem:[%s1529_s3 + $0xa] sm:$0x3] }
0x18fc   :  { %v680_v0 = vadd.f32 %v679_v63, %v648_v62 }
0x18fe   :  { %1145 = vtanh.f32 %v680_v0  ;;  %v1100_v0 = vld [vmem:[%s1534_s8] ss:$0 sm:$0xff]  ;;  %s1091_s8 = sld [smem:[#allocation3 + $0x6]] }
0x1904   :  { %v1146_v57 = vpop.eup %1145  ;;  %p980_p6 = scmp.gt.s32.totalorder %s1091_s8, 0 }
0x1905   :  { %686 = vrot.lane.b32.xlu2 %v1146_v57, %s1180_s15  ;;  %v682_v58 = vmul.f32 0.5, %v1146_v57 }
0x1906   :  { %s984_s21 = scalar_select %p980_p6, 1, 0 }
0x1907   :  { %v683_v1 = vadd.f32 0.5, %v682_v58 }
0x1909   :  { %v684_v4 = vmul.f32 %v683_v1, %v617_v51  ;;  %v58_v51 = vld [vmem:[%s1533_s7 + $0x8] sm:$0xff] }
0x195f   :  { %v687_v2 = vpop.permute.xlu2 %686 }
0x1960   :  { %v689_v3 = vmul.f32 %v687_v2, %v683_v1 }
0x1962   :  { %691 = vrot.lane.b32.xlu0 %v689_v3, %s1181_s0 }
0x19d4   :  { %v692_v5 = vpop.permute.xlu0 %691 }
0x19d5   :  { %v694_v6 = vadd.f32 %v692_v5, %v684_v4 }
0x19d7   :  { %1147 = vtanh.f32 %v694_v6 }
0x19dd   :  { %v1148_v7 = vpop.eup %1147 }
0x19de   :  { %697 = vrot.lane.b32.xlu1 %v1148_v7, %s1180_s15 }
0x1a50   :  { %v698_v8 = vpop.permute.xlu1 %697 }
0x1a51   :  { %v700_v9 = vmul.f32 %v698_v8, %v683_v1 }
0x1a53   :  { %702 = vrot.lane.b32.xlu2 %v700_v9, %s1181_s0 }
0x1aad   :  { %v703_v10 = vpop.permute.xlu2 %702 }
0x1aae   :  { %705 = vst.msk [vmem:[#allocation2 + $0x6] sm:$0x3] %vm474_vm1, %v703_v10  ;;  %1077 = vmatmul.msk.f32.vlgmr.msra.gmra.mxu2 %vm99_vm0, %v703_v10  ;;  %1078 = vmatmul.msk.f32.vlgmr.msra.gmra.mxu3 %vm99_vm0, %v703_v10 }
0x1aaf   :  { %1034 = vmatpush.msra.mxu2 %v60_v49 }
0x1ab1   :  { %1035 = vmatpush.msra.mxu2 %v59_v50 }
0x1ab3   :  { %1036 = vmatpush.msra.mxu2 %v58_v51 }
0x1ab5   :  { %1037 = vmatpush.msra.mxu2 %v57_v52  ;;  %v1014_v54 = vld [vmem:[#allocation2] sm:$0xff] }
0x1b31   :  { %v745_v12 = vpop.f32.mrf.mxu3  ;;  %v725_v15 = vpop.f32.mrf.mxu2 }
0x1b32   :  { %v752_v14 = vadd.f32 %v1408_v17, %v745_v12 }
0x1b34   :  { %v756_v16 = vsel %vm755_vm5, %v1080_v13, %v752_v14  ;;  %v985_v13 = vstv %s984_s21 }
0x1b35   :  { %v757_v18 = vadd.f32 %v756_v16, %v725_v15  ;;  %v1092_v15 = vld [vmem:[%s1529_s3 + $0xc] sm:$0x3]  ;;  %vm986_vm8 = vcmp.eq.s32.totalorder %v985_v13, 1 }
0x1b37   :  { %1149 = vtanh.f32 %v757_v18 }
0x1b3d   :  { %v1150_v19 = vpop.eup %1149 }
0x1b3e   :  { %763 = vrot.lane.b32.xlu0 %v1150_v19, %s1180_s15  ;;  %v759_v20 = vmul.f32 0.5, %v1150_v19 }
0x1b40   :  { %v760_v21 = vadd.f32 0.5, %v759_v20 }
0x1b42   :  { %v761_v24 = vmul.f32 %v760_v21, %v694_v6 }
0x1bb0   :  { %v764_v22 = vpop.permute.xlu0 %763 }
0x1bb1   :  { %v766_v23 = vmul.f32 %v764_v22, %v760_v21 }
0x1bb3   :  { %768 = vrot.lane.b32.xlu1 %v766_v23, %s1181_s0 }
0x1c25   :  { %v769_v25 = vpop.permute.xlu1 %768 }
0x1c26   :  { %v771_v26 = vadd.f32 %v769_v25, %v761_v24 }
0x1c28   :  { %1151 = vtanh.f32 %v771_v26 }
0x1c2e   :  { %v1152_v27 = vpop.eup %1151 }
0x1c2f   :  { %774 = vrot.lane.b32.xlu2 %v1152_v27, %s1180_s15 }
0x1c89   :  { %v775_v28 = vpop.permute.xlu2 %774 }
0x1c8a   :  { %v777_v29 = vmul.f32 %v775_v28, %v760_v21 }
0x1c8c   :  { %779 = vrot.lane.b32.xlu0 %v777_v29, %s1181_s0 }
0x1cfe   :  { %v780_v30 = vpop.permute.xlu0 %779 }
0x1cff   :  { %782 = vst.msk [vmem:[#allocation2 + $0x8] sm:$0x3] %vm474_vm1, %v780_v30  ;;  %1081 = vmatmul.msk.f32.vlgmr.msra.gmra.mxu0 %vm99_vm0, %v780_v30  ;;  %1082 = vmatmul.msk.f32.vlgmr.msra.gmra.mxu1 %vm99_vm0, %v780_v30 }
0x1d7c   :  { %v822_v32 = vpop.f32.mrf.mxu1  ;;  %v802_v35 = vpop.f32.mrf.mxu0 }
0x1d7d   :  { %v829_v34 = vadd.f32 %v1408_v17, %v822_v32 }
0x1d7f   :  { %v833_v36 = vsel %vm832_vm6, %v1084_v33, %v829_v34 }
0x1d80   :  { %v834_v37 = vadd.f32 %v833_v36, %v802_v35 }
0x1d82   :  { %1153 = vtanh.f32 %v834_v37 }
0x1d88   :  { %v1154_v38 = vpop.eup %1153 }
0x1d89   :  { %840 = vrot.lane.b32.xlu1 %v1154_v38, %s1180_s15  ;;  %v836_v39 = vmul.f32 0.5, %v1154_v38 }
0x1d8b   :  { %v837_v40 = vadd.f32 0.5, %v836_v39 }
0x1d8d   :  { %v838_v43 = vmul.f32 %v837_v40, %v771_v26 }
0x1dfb   :  { %v841_v41 = vpop.permute.xlu1 %840 }
0x1dfc   :  { %v843_v42 = vmul.f32 %v841_v41, %v837_v40 }
0x1dfe   :  { %845 = vrot.lane.b32.xlu2 %v843_v42, %s1181_s0 }
0x1e58   :  { %v846_v44 = vpop.permute.xlu2 %845 }
0x1e59   :  { %v848_v45 = vadd.f32 %v846_v44, %v838_v43 }
0x1e5b   :  { %1155 = vtanh.f32 %v848_v45 }
0x1e61   :  { %v1156_v46 = vpop.eup %1155 }
0x1e62   :  { %851 = vrot.lane.b32.xlu0 %v1156_v46, %s1180_s15 }
0x1ed4   :  { %v852_v47 = vpop.permute.xlu0 %851 }
0x1ed5   :  { %v854_v48 = vmul.f32 %v852_v47, %v837_v40 }
0x1ed7   :  { %856 = vrot.lane.b32.xlu1 %v854_v48, %s1181_s0 }
0x1f49   :  { %v857_v53 = vpop.permute.xlu1 %856 }
0x1f4a   :  { %859 = vst.msk [vmem:[#allocation2 + $0xa] sm:$0x3] %vm474_vm1, %v857_v53  ;;  %1085 = vmatmul.msk.f32.vlgmr.msrb.gmra.mxu2 %vm99_vm0, %v857_v53  ;;  %1086 = vmatmul.msk.f32.vlgmr.msrb.gmra.mxu3 %vm99_vm0, %v857_v53 }
0x1f52   :  { %1093 = vmatmul.msk.f32.vlgmr.msra.gmra.mxu2 %vm99_vm0, %v1014_v54 }
0x1fcd   :  { %v879_v60 = vpop.f32.mrf.mxu2  ;;  %v899_v61 = vpop.f32.mrf.mxu3 }
0x1fce   :  { %v906_v56 = vadd.f32 %v1408_v17, %v899_v61 }
0x1fd0   :  { %v910_v62 = vsel %vm909_vm7, %v1088_v55, %v906_v56 }
0x1fd1   :  { %v911_v63 = vadd.f32 %v910_v62, %v879_v60 }
0x1fd3   :  { %1157 = vtanh.f32 %v911_v63 }
0x1fd5   :  { %v1039_v57 = vpop.f32.mrf.mxu2 }
0x1fd6   :  { %v1040_v58 = vadd.f32 %v1100_v0, %v1039_v57 }
0x1fd8   :  { %1045 = vst.msk [vmem:[%s1535_s9] sm:$0xff] %vm99_vm0, %v1040_v58 }
0x1fd9   :  { %v1158_v1 = vpop.eup %1157 }
0x1fda   :  { %917 = vrot.lane.b32.xlu2 %v1158_v1, %s1180_s15  ;;  %v913_v2 = vmul.f32 0.5, %v1158_v1 }
0x1fdc   :  { %v914_v3 = vadd.f32 0.5, %v913_v2 }
0x1fde   :  { %v915_v6 = vmul.f32 %v914_v3, %v848_v45 }
0x2034   :  { %v918_v4 = vpop.permute.xlu2 %917 }
0x2035   :  { %v920_v5 = vmul.f32 %v918_v4, %v914_v3 }
0x2037   :  { %922 = vrot.lane.b32.xlu0 %v920_v5, %s1181_s0 }
0x20a9   :  { %v923_v7 = vpop.permute.xlu0 %922 }
0x20aa   :  { %v925_v8 = vadd.f32 %v923_v7, %v915_v6 }
0x20ac   :  { %1159 = vtanh.f32 %v925_v8 }
0x20b2   :  { %v1160_v9 = vpop.eup %1159 }
0x20b3   :  { %928 = vrot.lane.b32.xlu1 %v1160_v9, %s1180_s15 }
0x2125   :  { %v929_v10 = vpop.permute.xlu1 %928 }
0x2126   :  { %v931_v11 = vmul.f32 %v929_v10, %v914_v3 }
0x2128   :  { %933 = vrot.lane.b32.xlu2 %v931_v11, %s1181_s0 }
0x2182   :  { %v934_v12 = vpop.permute.xlu2 %933 }
0x2183   :  { %936 = vst.msk [vmem:[#allocation2 + $0xc] sm:$0x3] %vm474_vm1, %v934_v12  ;;  %1089 = vmatmul.msk.f32.vlgmr.msrb.gmra.mxu0 %vm99_vm0, %v934_v12  ;;  %1090 = vmatmul.msk.f32.vlgmr.msrb.gmra.mxu1 %vm99_vm0, %v934_v12 }
0x2200   :  { %v976_v14 = vpop.f32.mrf.mxu1  ;;  %v956_v18 = vpop.f32.mrf.mxu0 }
0x2201   :  { %v983_v16 = vadd.f32 %v1408_v17, %v976_v14 }
0x2203   :  { %v987_v19 = vsel %vm986_vm8, %v1092_v15, %v983_v16 }
0x2204   :  { %v988_v20 = vadd.f32 %v987_v19, %v956_v18 }
0x2206   :  { %1161 = vtanh.f32 %v988_v20 }
0x220c   :  { %v1162_v21 = vpop.eup %1161 }
0x220d   :  { %994 = vrot.lane.b32.xlu0 %v1162_v21, %s1180_s15  ;;  %v990_v22 = vmul.f32 0.5, %v1162_v21 }
0x220f   :  { %v991_v23 = vadd.f32 0.5, %v990_v22 }
0x2211   :  { %v992_v26 = vmul.f32 %v991_v23, %v925_v8 }
0x227f   :  { %v995_v24 = vpop.permute.xlu0 %994 }
0x2280   :  { %v997_v25 = vmul.f32 %v995_v24, %v991_v23 }
0x2282   :  { %999 = vrot.lane.b32.xlu1 %v997_v25, %s1181_s0 }
0x22f4   :  { %v1000_v27 = vpop.permute.xlu1 %999 }
0x22f5   :  { %v1002_v28 = vadd.f32 %v1000_v27, %v992_v26 }
0x22f7   :  { %1163 = vtanh.f32 %v1002_v28 }
0x22fd   :  { %v1164_v29 = vpop.eup %1163 }
0x22fe   :  { %1005 = vrot.lane.b32.xlu2 %v1164_v29, %s1180_s15 }
0x2358   :  { %v1006_v17 = vpop.permute.xlu2 %1005 }
0x2359   :  { %v1008_v30 = vmul.f32 %v1006_v17, %v991_v23 }
0x235b   :  { %1010 = vrot.lane.b32.xlu0 %v1008_v30, %s1181_s0 }
0x23cd   :  { %v1011_v31 = vpop.permute.xlu0 %1010 }
0x23ce   :  { %1013 = vst.msk [vmem:[#allocation2 + $0xe] sm:$0x3] %vm474_vm1, %v1011_v31 }
0x23d5   :  { %v1015_v32 = vld [vmem:[#allocation2 + $0x8] sm:$0xff] }
0x23d6   :  { %1094 = vmatmul.msk.f32.gmra.mxu2 %vm99_vm0, %v1015_v32 }
0x2459   :  { %v1042_v33 = vpop.f32.mrf.mxu2 }
0x245a   :  { %v1043_v34 = vadd.f32 %v1100_v0, %v1042_v33 }
0x245c   :  { %1046 = vst.msk [vmem:[%s1535_s9 + $0x8] sm:$0xff] %vm99_vm0, %v1043_v34 }
0x245d   :  { %1051 = vsyncpa [#allocation4], 1 }

</bundles_post_ra>
